<compile_context>
chip_gen: v6e
topology: v6e:2x2x1
jax: 0.10.0
libtpu: 0.0.40
codegen_flags: <defaults>
</compile_context>

<pallas_src>
import jax
import jax.numpy as jnp
import numpy as np
from jax import lax
from jax.experimental import pallas as pl
from jax.experimental.pallas import tpu as pltpu


# ---------------------------------------------------------------------------
# Pallas kernel: fused embedding + bidirectional GRU + gather + Linear
# ---------------------------------------------------------------------------
def encoder_kernel(idx_ref,    # SMEM scalar prefetch: (T,) int32, idx = x_len - 1
                   x_ref,      # VMEM (T, tile_n, 1) int32 token ids
                   emb_ref,    # VMEM (vocab, H) embedding table  [matmul dtype]
                   wih_ref,    # VMEM (2H, 6H) block-diag input weights, gate-grouped
                   whh_ref,    # VMEM (2H, 6H) block-diag recurrent weights, gate-grouped
                   bgi_ref,    # VMEM (1, 6H) f32: b_ih (all gates) + b_hh (r,z only)
                   bhn_ref,    # VMEM (1, 2H) f32: [b_hh_n_f | b_hh_n_b]
                   wlin_ref,   # VMEM (2H, L) hidden2latent weight
                   out_ref):   # VMEM (T, L)  (leading grid dim squeezed)
    T, tile_n, _ = x_ref.shape
    vocab, H = emb_ref.shape
    G = 2 * H                                     # per-gate width: [fwd | bwd]
    md = whh_ref.dtype                            # matmul operand dtype (f32 or bf16)

    n_off = pl.program_id(0) * tile_n             # global N offset of this tile

    # ---- fused embedding lookup: one-hot matmul on the (idle) MXU ----------
    oh = x_ref[...] == lax.broadcasted_iota(jnp.int32, (T, tile_n, vocab), 2)
    oh2 = oh.astype(jnp.float32).reshape(T * tile_n, vocab).astype(md)
    emb2d = jnp.dot(oh2, emb_ref[...], preferred_element_type=jnp.float32)   # (T*tile_n, H)

    # time-reversed copy for the backward direction (static row-block slices)
    emb_rev = jnp.concatenate(
        [emb2d[(T - 1 - t) * tile_n:(T - t) * tile_n, :] for t in range(T)], axis=0)
    emb_comb = jnp.concatenate([emb2d, emb_rev], axis=1).astype(md)          # (T*tile_n, 2H)

    # ---- hoisted input projection: ONE matmul for both directions ----------
    # columns are gate-grouped: [r_f|r_b | z_f|z_b | n_f|n_b]; b_ih and the
    # r/z chunks of b_hh are folded into bgi.
    gi = jnp.dot(emb_comb, wih_ref[...], preferred_element_type=jnp.float32) + bgi_ref[...]

    whh = whh_ref[...]                                        # hoisted weight read
    bhn = jnp.broadcast_to(bhn_ref[...], (tile_n, G))         # hoisted broadcast
    iota_n = lax.broadcasted_iota(jnp.int32, (tile_n, 1), 0) + n_off

    h = jnp.zeros((tile_n, G), jnp.float32)                   # [h_f | h_b]
    gf_rows = [None] * T                                      # register accumulation
    gb_rows = [None] * T

    # T == batch of the original module -> small & static; fully unrolled so the
    # LLO scheduler interleaves the fwd/bwd work.  Only ONE recurrent matmul per
    # step remains on the serial chain (block-diagonal fwd+bwd weight).
    for t in range(T):
        tb = T - 1 - t
        gi_t = gi[t * tile_n:(t + 1) * tile_n, :]             # (tile_n, 6H)
        gh = jnp.dot(h.astype(md), whh, preferred_element_type=jnp.float32)
        r = jax.nn.sigmoid(gi_t[:, :G] + gh[:, :G])
        z = jax.nn.sigmoid(gi_t[:, G:2 * G] + gh[:, G:2 * G])
        n = jnp.tanh(gi_t[:, 2 * G:] + r * (gh[:, 2 * G:] + bhn))
        h = (1.0 - z) * n + z * h
        # fused gather at x_len-1 (kept in registers; no scratch stores):
        #   fwd half of h is the encoder output at time t,
        #   bwd half of h is the encoder output at time tb = T-1-t.
        mask_f = iota_n == idx_ref[t]                         # (tile_n, 1)
        mask_b = iota_n == idx_ref[tb]
        gf_rows[t] = jnp.sum(jnp.where(mask_f, h[:, :H], 0.0), axis=0, keepdims=True)
        gb_rows[tb] = jnp.sum(jnp.where(mask_b, h[:, H:], 0.0), axis=0, keepdims=True)

    # ---- hidden2latent Linear on the gathered [fwd | bwd] rows --------------
    last = jnp.concatenate([jnp.concatenate(gf_rows, axis=0),
                            jnp.concatenate(gb_rows, axis=0)], axis=1)       # (T, 2H)
    # bias + cross-tile sum are handled exactly once in the wrapper
    out_ref[...] = jnp.dot(last.astype(md), wlin_ref[...],
                           preferred_element_type=jnp.float32)


# ---------------------------------------------------------------------------
# Wrapper: parameter fusion (block-diag / gate-grouped weights) + pallas_call
# ---------------------------------------------------------------------------
def _gate_blockdiag(wf, wb, H):
    """(K, 3H) fwd/bwd weights with columns [r|z|n] -> (2K, 6H) block-diagonal,
    gate-grouped columns [r_f|r_b|z_f|z_b|n_f|n_b]; rows [:K] fwd, [K:] bwd."""
    K = wf.shape[0]
    Z = jnp.zeros((K, H), wf.dtype)
    top = jnp.concatenate([wf[:, :H], Z, wf[:, H:2 * H], Z, wf[:, 2 * H:], Z], axis=1)
    bot = jnp.concatenate([Z, wb[:, :H], Z, wb[:, H:2 * H], Z, wb[:, 2 * H:]], axis=1)
    return jnp.concatenate([top, bot], axis=0)


def encoder_forward(x, x_len, emb_table, p, *, tile_n=None, matmul_dtype=jnp.float32):
    T, N = x.shape                      # T = batch ("time"), N = seq ("GRU batch")
    vocab, H = emb_table.shape
    L = p["w_lin"].shape[1]
    md = matmul_dtype

    if tile_n is None:
        tile_n = N                      # single block: best on 1-TC chips (v5e/v6e)
    assert N % tile_n == 0 and (tile_n == N or tile_n % 8 == 0), \
        "tile_n must divide N and be a multiple of 8 (or equal N)"
    num_blocks = N // tile_n            # v7x megacore: use tile_n = N//2 -> 2 blocks

    # --- fused / reordered parameters (tiny; pre-cast to matmul dtype here) ---
    wih_blk = _gate_blockdiag(p["w_ih_f"], p["w_ih_b"], H).astype(md)     # (2H, 6H)
    whh_blk = _gate_blockdiag(p["w_hh_f"], p["w_hh_b"], H).astype(md)     # (2H, 6H)
    bgi = jnp.concatenate(                                                # (1, 6H) f32
        [p["b_ih_f"][:, :H] + p["b_hh_f"][:, :H],
         p["b_ih_b"][:, :H] + p["b_hh_b"][:, :H],
         p["b_ih_f"][:, H:2 * H] + p["b_hh_f"][:, H:2 * H],
         p["b_ih_b"][:, H:2 * H] + p["b_hh_b"][:, H:2 * H],
         p["b_ih_f"][:, 2 * H:], p["b_ih_b"][:, 2 * H:]], axis=1)
    bhn = jnp.concatenate([p["b_hh_f"][:, 2 * H:], p["b_hh_b"][:, 2 * H:]], axis=1)
    emb_md = emb_table.astype(md)
    wlin_md = p["w_lin"].astype(md)

    # nn.Dropout: identity in eval mode.
    idx = (x_len - 1).astype(jnp.int32)               # (T,)
    x3 = x.astype(jnp.int32)[:, :, None]              # (T, N, 1): N-tile isn't the lane dim

    full2 = lambda j, ids: (0, 0)                     # whole-array weight blocks

    grid_spec = pltpu.PrefetchScalarGridSpec(
        num_scalar_prefetch=1,
        grid=(num_blocks,),
        in_specs=[
            pl.BlockSpec((T, tile_n, 1), lambda j, ids: (0, j, 0)),   # token ids
            pl.BlockSpec((vocab, H), full2),                          # embedding table
            pl.BlockSpec((2 * H, 6 * H), full2),                      # w_ih (block-diag)
            pl.BlockSpec((2 * H, 6 * H), full2),                      # w_hh (block-diag)
            pl.BlockSpec((1, 6 * H), full2),                          # folded gi bias
            pl.BlockSpec((1, 2 * H), full2),                          # b_hh n-chunk
            pl.BlockSpec((2 * H, L), full2),                          # hidden2latent w
        ],
        out_specs=pl.BlockSpec((None, T, L), lambda j, ids: (j, 0, 0)),
    )

    partials = pl.pallas_call(
        encoder_kernel,
        out_shape=jax.ShapeDtypeStruct((num_blocks, T, L), jnp.float32),
        grid_spec=grid_spec,
        compiler_params=pltpu.CompilerParams(dimension_semantics=("parallel",)),
    )(idx, x3, emb_md, wih_blk, whh_blk, bgi, bhn, wlin_md)

    # Non-matching N-tiles contribute exact zeros, so summing partials is exact;
    # the Linear bias is added exactly once, here.
    return jnp.sum(partials, axis=0) + p["b_lin"]


encoder_forward_jit = jax.jit(encoder_forward,
                              static_argnames=("tile_n", "matmul_dtype"))


# ---------------------------------------------------------------------------
# Pure-JAX reference (same math, lax.scan) for a correctness check
# ---------------------------------------------------------------------------
def encoder_reference(x, x_len, emb_table, p):
    emb = emb_table[x].astype(jnp.float32)        # (T, N, H)
    T, N, H = emb.shape
    h0 = jnp.zeros((N, H), jnp.float32)

    def step(h, x_t, wih, whh, bih, bhh):
        gi = x_t @ wih + bih
        gh = h @ whh + bhh
        r = jax.nn.sigmoid(gi[:, :H] + gh[:, :H])
        z = jax.nn.sigmoid(gi[:, H:2 * H] + gh[:, H:2 * H])
        n = jnp.tanh(gi[:, 2 * H:] + r * gh[:, 2 * H:])
        return (1.0 - z) * n + z * h

    def scan_f(h, x_t):
        h = step(h, x_t, p["w_ih_f"], p["w_hh_f"], p["b_ih_f"], p["b_hh_f"])
        return h, h

    def scan_b(h, x_t):
        h = step(h, x_t, p["w_ih_b"], p["w_hh_b"], p["b_ih_b"], p["b_hh_b"])
        return h, h

    _, outs_f = lax.scan(scan_f, h0, emb)
    _, outs_b_rev = lax.scan(scan_b, h0, emb[::-1])
    outs_b = outs_b_rev[::-1]
    enc = jnp.concatenate([outs_f, outs_b], axis=-1)          # (T, N, 2H)
    idx = (x_len - 1).astype(jnp.int32)
    last = enc[jnp.arange(T), idx, :]                         # (T, 2H)
    return last @ p["w_lin"] + p["b_lin"]


# ---------------------------------------------------------------------------
# Deterministic synthetic parameters & inputs
# ---------------------------------------------------------------------------
def make_params(key, vocab, hidden, latent):
    H, L = hidden, latent
    ks = jax.random.split(key, 12)
    scale = 1.0 / np.sqrt(H)
    u = lambda k, shape: jax.random.uniform(k, shape, jnp.float32, -scale, scale)
    params = {
        # GRU weights stored transposed vs PyTorch (weight_ih_l0 is (3H, H));
        # kernel-side fused weights are built from this (H, 3H) [r|z|n] layout.
        "w_ih_f": u(ks[0], (H, 3 * H)), "w_hh_f": u(ks[1], (H, 3 * H)),
        "b_ih_f": u(ks[2], (1, 3 * H)), "b_hh_f": u(ks[3], (1, 3 * H)),
        "w_ih_b": u(ks[4], (H, 3 * H)), "w_hh_b": u(ks[5], (H, 3 * H)),
        "b_ih_b": u(ks[6], (1, 3 * H)), "b_hh_b": u(ks[7], (1, 3 * H)),
        # nn.Linear(2H, L): weight (L, 2H) stored transposed as (2H, L)
        "w_lin": u(ks[8], (2 * H, L)), "b_lin": u(ks[9], (1, L)),
    }
    emb_table = jax.random.normal(ks[10], (vocab, H), jnp.float32) * 0.1
    return params, emb_table


if __name__ == "__main__":
    BATCH, SEQ, HIDDEN, LATENT, VOCAB = 4, 16, 32, 16, 50

    key = jax.random.PRNGKey(0)
    k_par, k_x, k_len = jax.random.split(key, 3)

    params, emb_table = make_params(k_par, VOCAB, HIDDEN, LATENT)
    x = jax.random.randint(k_x, (BATCH, SEQ), 0, VOCAB, dtype=jnp.int32)
    x_len = jax.random.randint(k_len, (BATCH,), 1, SEQ + 1, dtype=jnp.int32)

    ref = encoder_reference(x, x_len, emb_table, params)

    # 1) default: single N-block (best for single-TC v5e/v6e), f32 matmuls
    out = jax.block_until_ready(encoder_forward_jit(x, x_len, emb_table, params))
    np.testing.assert_allclose(np.asarray(out), np.asarray(ref), rtol=1e-4, atol=1e-4)
    assert out.shape == (BATCH, LATENT) and out.dtype == jnp.float32

    # 2) v7x megacore path: exactly two parallel N-blocks (tile_n = N // 2)
    out2 = jax.block_until_ready(
        encoder_forward_jit(x, x_len, emb_table, params, tile_n=SEQ // 2))
    np.testing.assert_allclose(np.asarray(out2), np.asarray(ref), rtol=1e-4, atol=1e-4)

    # 3) bf16 matmul operands (pre-cast in wrapper), f32 accumulation & gate math
    out3 = jax.block_until_ready(
        encoder_forward_jit(x, x_len, emb_table, params, tile_n=SEQ // 2,
                            matmul_dtype=jnp.bfloat16))
    np.testing.assert_allclose(np.asarray(out3), np.asarray(ref), rtol=1e-1, atol=1e-1)

    print("KERNEL_OK")
</pallas_src>

<mosaic_0001>
module attributes {stable_mosaic.version = 11 : i64} {
  func.func @encoder_kernel(%arg0: i32, %arg1: memref<4xi32, #tpu.memory_space<smem>>, %arg2: memref<4x16x1xi32, #tpu.memory_space<vmem>>, %arg3: memref<50x32xf32, #tpu.memory_space<vmem>>, %arg4: memref<64x192xf32, #tpu.memory_space<vmem>>, %arg5: memref<64x192xf32, #tpu.memory_space<vmem>>, %arg6: memref<1x192xf32, #tpu.memory_space<vmem>>, %arg7: memref<1x64xf32, #tpu.memory_space<vmem>>, %arg8: memref<64x16xf32, #tpu.memory_space<vmem>>, %arg9: memref<1x4x16xf32, #tpu.memory_space<vmem>>) attributes {dimension_semantics = [#tpu.dimension_semantics<parallel>], iteration_bounds = array<i64: 1>, scalar_prefetch = 1 : i64, scratch_operands = 0 : i64, tpu.core_type = #tpu.core_type<tc>, window_params = [{transform_indices = @transform_0, window_bounds = array<i64: 4, 16, 1>}, {pipeline_mode = #tpu.pipeline_mode<synchronous>, transform_indices = @transform_1, window_bounds = array<i64: 50, 32>}, {pipeline_mode = #tpu.pipeline_mode<synchronous>, transform_indices = @transform_2, window_bounds = array<i64: 64, 192>}, {pipeline_mode = #tpu.pipeline_mode<synchronous>, transform_indices = @transform_3, window_bounds = array<i64: 64, 192>}, {pipeline_mode = #tpu.pipeline_mode<synchronous>, transform_indices = @transform_4, window_bounds = array<i64: 1, 192>}, {pipeline_mode = #tpu.pipeline_mode<synchronous>, transform_indices = @transform_5, window_bounds = array<i64: 1, 64>}, {pipeline_mode = #tpu.pipeline_mode<synchronous>, transform_indices = @transform_6, window_bounds = array<i64: 64, 16>}, {transform_indices = @transform_7, window_bounds = array<i64: 1, 4, 16>}]} {
    %c16_i32 = arith.constant 16 : i32
    %0 = arith.muli %arg0, %c16_i32 : i32
    %c0 = arith.constant 0 : index
    %c0_0 = arith.constant 0 : index
    %c0_1 = arith.constant 0 : index
    %1 = vector.load %arg2[%c0, %c0_0, %c0_1] : memref<4x16x1xi32, #tpu.memory_space<vmem>>, vector<4x16x1xi32>
    %2 = tpu.iota {dimensions = array<i32: 2>} : vector<4x16x50xi32>
    %3 = vector.broadcast %1 : vector<4x16x1xi32> to vector<4x16x50xi32>
    %4 = arith.cmpi eq, %3, %2 : vector<4x16x50xi32>
    %5 = arith.extui %4 : vector<4x16x50xi1> to vector<4x16x50xi32>
    %6 = arith.sitofp %5 : vector<4x16x50xi32> to vector<4x16x50xf32>
    %7 = vector.shape_cast %6 : vector<4x16x50xf32> to vector<64x50xf32>
    %c0_2 = arith.constant 0 : index
    %c0_3 = arith.constant 0 : index
    %8 = vector.load %arg3[%c0_2, %c0_3] : memref<50x32xf32, #tpu.memory_space<vmem>>, vector<50x32xf32>
    %cst = arith.constant dense<0.000000e+00> : vector<64x32xf32>
    %9 = tpu.matmul %7, %8, %cst {dimension_numbers = #tpu.dot_dimension_numbers<[1], [0], [0], [1], [0, 0, 1, 1], [], []>} : vector<64x50xf32>, vector<50x32xf32>, vector<64x32xf32> -> vector<64x32xf32>
    %10 = vector.extract_strided_slice %9 {offsets = [48, 0], sizes = [16, 32], strides = [1, 1]} : vector<64x32xf32> to vector<16x32xf32>
    %11 = vector.extract_strided_slice %9 {offsets = [32, 0], sizes = [16, 32], strides = [1, 1]} : vector<64x32xf32> to vector<16x32xf32>
    %12 = vector.extract_strided_slice %9 {offsets = [16, 0], sizes = [16, 32], strides = [1, 1]} : vector<64x32xf32> to vector<16x32xf32>
    %13 = vector.extract_strided_slice %9 {offsets = [0, 0], sizes = [16, 32], strides = [1, 1]} : vector<64x32xf32> to vector<16x32xf32>
    %14 = tpu.concatenate %10, %11, %12, %13 in 0 : vector<16x32xf32>, vector<16x32xf32>, vector<16x32xf32>, vector<16x32xf32> -> vector<64x32xf32>
    %15 = tpu.concatenate %9, %14 in 1 : vector<64x32xf32>, vector<64x32xf32> -> vector<64x64xf32>
    %c0_4 = arith.constant 0 : index
    %c0_5 = arith.constant 0 : index
    %16 = vector.load %arg4[%c0_4, %c0_5] : memref<64x192xf32, #tpu.memory_space<vmem>>, vector<64x192xf32>
    %cst_6 = arith.constant dense<0.000000e+00> : vector<64x192xf32>
    %17 = tpu.matmul %15, %16, %cst_6 {dimension_numbers = #tpu.dot_dimension_numbers<[1], [0], [0], [1], [0, 0, 1, 1], [], []>} : vector<64x64xf32>, vector<64x192xf32>, vector<64x192xf32> -> vector<64x192xf32>
    %c0_7 = arith.constant 0 : index
    %c0_8 = arith.constant 0 : index
    %18 = vector.load %arg6[%c0_7, %c0_8] : memref<1x192xf32, #tpu.memory_space<vmem>>, vector<1x192xf32>
    %19 = vector.broadcast %18 : vector<1x192xf32> to vector<64x192xf32>
    %20 = arith.addf %17, %19 : vector<64x192xf32>
    %c0_9 = arith.constant 0 : index
    %c0_10 = arith.constant 0 : index
    %21 = vector.load %arg5[%c0_9, %c0_10] : memref<64x192xf32, #tpu.memory_space<vmem>>, vector<64x192xf32>
    %c0_11 = arith.constant 0 : index
    %c0_12 = arith.constant 0 : index
    %22 = vector.load %arg7[%c0_11, %c0_12] : memref<1x64xf32, #tpu.memory_space<vmem>>, vector<1x64xf32>
    %23 = vector.shape_cast %22 : vector<1x64xf32> to vector<1x64xf32>
    %24 = vector.broadcast %23 : vector<1x64xf32> to vector<16x64xf32>
    %25 = tpu.iota {dimensions = array<i32: 0>} : vector<16x1xi32>
    %26 = vector.broadcast %0 : i32 to vector<16x1xi32>
    %27 = arith.addi %25, %26 : vector<16x1xi32>
    %cst_13 = arith.constant 0.000000e+00 : f32
    %28 = vector.broadcast %cst_13 : f32 to vector<16x64xf32>
    %29 = vector.extract_strided_slice %20 {offsets = [0, 0], sizes = [16, 192], strides = [1, 1]} : vector<64x192xf32> to vector<16x192xf32>
    %cst_14 = arith.constant dense<0.000000e+00> : vector<16x192xf32>
    %30 = tpu.matmul %28, %21, %cst_14 {dimension_numbers = #tpu.dot_dimension_numbers<[1], [0], [0], [1], [0, 0, 1, 1], [], []>} : vector<16x64xf32>, vector<64x192xf32>, vector<16x192xf32> -> vector<16x192xf32>
    %31 = vector.extract_strided_slice %29 {offsets = [0, 0], sizes = [16, 64], strides = [1, 1]} : vector<16x192xf32> to vector<16x64xf32>
    %32 = vector.extract_strided_slice %30 {offsets = [0, 0], sizes = [16, 64], strides = [1, 1]} : vector<16x192xf32> to vector<16x64xf32>
    %33 = arith.addf %31, %32 : vector<16x64xf32>
    %34 = arith.negf %33 : vector<16x64xf32>
    %35 = math.exp %34 : vector<16x64xf32>
    %cst_15 = arith.constant 1.000000e+00 : f32
    %36 = vector.broadcast %cst_15 : f32 to vector<16x64xf32>
    %37 = arith.addf %36, %35 : vector<16x64xf32>
    %38 = arith.divf %36, %37 : vector<16x64xf32>
    %39 = vector.extract_strided_slice %29 {offsets = [0, 64], sizes = [16, 64], strides = [1, 1]} : vector<16x192xf32> to vector<16x64xf32>
    %40 = vector.extract_strided_slice %30 {offsets = [0, 64], sizes = [16, 64], strides = [1, 1]} : vector<16x192xf32> to vector<16x64xf32>
    %41 = arith.addf %39, %40 : vector<16x64xf32>
    %42 = arith.negf %41 : vector<16x64xf32>
    %43 = math.exp %42 : vector<16x64xf32>
    %cst_16 = arith.constant 1.000000e+00 : f32
    %44 = vector.broadcast %cst_16 : f32 to vector<16x64xf32>
    %45 = arith.addf %44, %43 : vector<16x64xf32>
    %46 = arith.divf %44, %45 : vector<16x64xf32>
    %47 = vector.extract_strided_slice %29 {offsets = [0, 128], sizes = [16, 64], strides = [1, 1]} : vector<16x192xf32> to vector<16x64xf32>
    %48 = vector.extract_strided_slice %30 {offsets = [0, 128], sizes = [16, 64], strides = [1, 1]} : vector<16x192xf32> to vector<16x64xf32>
    %49 = arith.addf %48, %24 : vector<16x64xf32>
    %50 = arith.mulf %38, %49 : vector<16x64xf32>
    %51 = arith.addf %47, %50 : vector<16x64xf32>
    %52 = math.tanh %51 : vector<16x64xf32>
    %cst_17 = arith.constant 1.000000e+00 : f32
    %53 = vector.broadcast %cst_17 : f32 to vector<16x64xf32>
    %54 = arith.subf %53, %46 : vector<16x64xf32>
    %55 = arith.mulf %54, %52 : vector<16x64xf32>
    %56 = arith.mulf %46, %28 : vector<16x64xf32>
    %57 = arith.addf %55, %56 : vector<16x64xf32>
    %c0_18 = arith.constant 0 : index
    %58 = memref.load %arg1[%c0_18] : memref<4xi32, #tpu.memory_space<smem>>
    %59 = vector.broadcast %58 : i32 to vector<16x1xi32>
    %60 = arith.cmpi eq, %27, %59 : vector<16x1xi32>
    %c3 = arith.constant 3 : index
    %61 = memref.load %arg1[%c3] : memref<4xi32, #tpu.memory_space<smem>>
    %62 = vector.broadcast %61 : i32 to vector<16x1xi32>
    %63 = arith.cmpi eq, %27, %62 : vector<16x1xi32>
    %64 = vector.extract_strided_slice %57 {offsets = [0, 0], sizes = [16, 32], strides = [1, 1]} : vector<16x64xf32> to vector<16x32xf32>
    %cst_19 = arith.constant 0.000000e+00 : f32
    %65 = vector.shape_cast %60 : vector<16x1xi1> to vector<16x1xi1>
    %66 = vector.broadcast %65 : vector<16x1xi1> to vector<16x32xi1>
    %67 = vector.broadcast %cst_19 : f32 to vector<16x32xf32>
    %68 = arith.select %66, %64, %67 : vector<16x32xi1>, vector<16x32xf32>
    %cst_20 = arith.constant dense<0.000000e+00> : vector<32xf32>
    %69 = vector.multi_reduction <add>, %68, %cst_20 [0] : vector<16x32xf32> to vector<32xf32>
    %70 = vector.shape_cast %69 : vector<32xf32> to vector<1x32xf32>
    %71 = vector.extract_strided_slice %57 {offsets = [0, 32], sizes = [16, 32], strides = [1, 1]} : vector<16x64xf32> to vector<16x32xf32>
    %cst_21 = arith.constant 0.000000e+00 : f32
    %72 = vector.shape_cast %63 : vector<16x1xi1> to vector<16x1xi1>
    %73 = vector.broadcast %72 : vector<16x1xi1> to vector<16x32xi1>
    %74 = vector.broadcast %cst_21 : f32 to vector<16x32xf32>
    %75 = arith.select %73, %71, %74 : vector<16x32xi1>, vector<16x32xf32>
    %cst_22 = arith.constant dense<0.000000e+00> : vector<32xf32>
    %76 = vector.multi_reduction <add>, %75, %cst_22 [0] : vector<16x32xf32> to vector<32xf32>
    %77 = vector.shape_cast %76 : vector<32xf32> to vector<1x32xf32>
    %78 = vector.extract_strided_slice %20 {offsets = [16, 0], sizes = [16, 192], strides = [1, 1]} : vector<64x192xf32> to vector<16x192xf32>
    %cst_23 = arith.constant dense<0.000000e+00> : vector<16x192xf32>
    %79 = tpu.matmul %57, %21, %cst_23 {dimension_numbers = #tpu.dot_dimension_numbers<[1], [0], [0], [1], [0, 0, 1, 1], [], []>} : vector<16x64xf32>, vector<64x192xf32>, vector<16x192xf32> -> vector<16x192xf32>
    %80 = vector.extract_strided_slice %78 {offsets = [0, 0], sizes = [16, 64], strides = [1, 1]} : vector<16x192xf32> to vector<16x64xf32>
    %81 = vector.extract_strided_slice %79 {offsets = [0, 0], sizes = [16, 64], strides = [1, 1]} : vector<16x192xf32> to vector<16x64xf32>
    %82 = arith.addf %80, %81 : vector<16x64xf32>
    %83 = arith.negf %82 : vector<16x64xf32>
    %84 = math.exp %83 : vector<16x64xf32>
    %cst_24 = arith.constant 1.000000e+00 : f32
    %85 = vector.broadcast %cst_24 : f32 to vector<16x64xf32>
    %86 = arith.addf %85, %84 : vector<16x64xf32>
    %87 = arith.divf %85, %86 : vector<16x64xf32>
    %88 = vector.extract_strided_slice %78 {offsets = [0, 64], sizes = [16, 64], strides = [1, 1]} : vector<16x192xf32> to vector<16x64xf32>
    %89 = vector.extract_strided_slice %79 {offsets = [0, 64], sizes = [16, 64], strides = [1, 1]} : vector<16x192xf32> to vector<16x64xf32>
    %90 = arith.addf %88, %89 : vector<16x64xf32>
    %91 = arith.negf %90 : vector<16x64xf32>
    %92 = math.exp %91 : vector<16x64xf32>
    %cst_25 = arith.constant 1.000000e+00 : f32
    %93 = vector.broadcast %cst_25 : f32 to vector<16x64xf32>
    %94 = arith.addf %93, %92 : vector<16x64xf32>
    %95 = arith.divf %93, %94 : vector<16x64xf32>
    %96 = vector.extract_strided_slice %78 {offsets = [0, 128], sizes = [16, 64], strides = [1, 1]} : vector<16x192xf32> to vector<16x64xf32>
    %97 = vector.extract_strided_slice %79 {offsets = [0, 128], sizes = [16, 64], strides = [1, 1]} : vector<16x192xf32> to vector<16x64xf32>
    %98 = arith.addf %97, %24 : vector<16x64xf32>
    %99 = arith.mulf %87, %98 : vector<16x64xf32>
    %100 = arith.addf %96, %99 : vector<16x64xf32>
    %101 = math.tanh %100 : vector<16x64xf32>
    %cst_26 = arith.constant 1.000000e+00 : f32
    %102 = vector.broadcast %cst_26 : f32 to vector<16x64xf32>
    %103 = arith.subf %102, %95 : vector<16x64xf32>
    %104 = arith.mulf %103, %101 : vector<16x64xf32>
    %105 = arith.mulf %95, %57 : vector<16x64xf32>
    %106 = arith.addf %104, %105 : vector<16x64xf32>
    %c1 = arith.constant 1 : index
    %107 = memref.load %arg1[%c1] : memref<4xi32, #tpu.memory_space<smem>>
    %108 = vector.broadcast %107 : i32 to vector<16x1xi32>
    %109 = arith.cmpi eq, %27, %108 : vector<16x1xi32>
    %c2 = arith.constant 2 : index
    %110 = memref.load %arg1[%c2] : memref<4xi32, #tpu.memory_space<smem>>
    %111 = vector.broadcast %110 : i32 to vector<16x1xi32>
    %112 = arith.cmpi eq, %27, %111 : vector<16x1xi32>
    %113 = vector.extract_strided_slice %106 {offsets = [0, 0], sizes = [16, 32], strides = [1, 1]} : vector<16x64xf32> to vector<16x32xf32>
    %cst_27 = arith.constant 0.000000e+00 : f32
    %114 = vector.shape_cast %109 : vector<16x1xi1> to vector<16x1xi1>
    %115 = vector.broadcast %114 : vector<16x1xi1> to vector<16x32xi1>
    %116 = vector.broadcast %cst_27 : f32 to vector<16x32xf32>
    %117 = arith.select %115, %113, %116 : vector<16x32xi1>, vector<16x32xf32>
    %cst_28 = arith.constant dense<0.000000e+00> : vector<32xf32>
    %118 = vector.multi_reduction <add>, %117, %cst_28 [0] : vector<16x32xf32> to vector<32xf32>
    %119 = vector.shape_cast %118 : vector<32xf32> to vector<1x32xf32>
    %120 = vector.extract_strided_slice %106 {offsets = [0, 32], sizes = [16, 32], strides = [1, 1]} : vector<16x64xf32> to vector<16x32xf32>
    %cst_29 = arith.constant 0.000000e+00 : f32
    %121 = vector.shape_cast %112 : vector<16x1xi1> to vector<16x1xi1>
    %122 = vector.broadcast %121 : vector<16x1xi1> to vector<16x32xi1>
    %123 = vector.broadcast %cst_29 : f32 to vector<16x32xf32>
    %124 = arith.select %122, %120, %123 : vector<16x32xi1>, vector<16x32xf32>
    %cst_30 = arith.constant dense<0.000000e+00> : vector<32xf32>
    %125 = vector.multi_reduction <add>, %124, %cst_30 [0] : vector<16x32xf32> to vector<32xf32>
    %126 = vector.shape_cast %125 : vector<32xf32> to vector<1x32xf32>
    %127 = vector.extract_strided_slice %20 {offsets = [32, 0], sizes = [16, 192], strides = [1, 1]} : vector<64x192xf32> to vector<16x192xf32>
    %cst_31 = arith.constant dense<0.000000e+00> : vector<16x192xf32>
    %128 = tpu.matmul %106, %21, %cst_31 {dimension_numbers = #tpu.dot_dimension_numbers<[1], [0], [0], [1], [0, 0, 1, 1], [], []>} : vector<16x64xf32>, vector<64x192xf32>, vector<16x192xf32> -> vector<16x192xf32>
    %129 = vector.extract_strided_slice %127 {offsets = [0, 0], sizes = [16, 64], strides = [1, 1]} : vector<16x192xf32> to vector<16x64xf32>
    %130 = vector.extract_strided_slice %128 {offsets = [0, 0], sizes = [16, 64], strides = [1, 1]} : vector<16x192xf32> to vector<16x64xf32>
    %131 = arith.addf %129, %130 : vector<16x64xf32>
    %132 = arith.negf %131 : vector<16x64xf32>
    %133 = math.exp %132 : vector<16x64xf32>
    %cst_32 = arith.constant 1.000000e+00 : f32
    %134 = vector.broadcast %cst_32 : f32 to vector<16x64xf32>
    %135 = arith.addf %134, %133 : vector<16x64xf32>
    %136 = arith.divf %134, %135 : vector<16x64xf32>
    %137 = vector.extract_strided_slice %127 {offsets = [0, 64], sizes = [16, 64], strides = [1, 1]} : vector<16x192xf32> to vector<16x64xf32>
    %138 = vector.extract_strided_slice %128 {offsets = [0, 64], sizes = [16, 64], strides = [1, 1]} : vector<16x192xf32> to vector<16x64xf32>
    %139 = arith.addf %137, %138 : vector<16x64xf32>
    %140 = arith.negf %139 : vector<16x64xf32>
    %141 = math.exp %140 : vector<16x64xf32>
    %cst_33 = arith.constant 1.000000e+00 : f32
    %142 = vector.broadcast %cst_33 : f32 to vector<16x64xf32>
    %143 = arith.addf %142, %141 : vector<16x64xf32>
    %144 = arith.divf %142, %143 : vector<16x64xf32>
    %145 = vector.extract_strided_slice %127 {offsets = [0, 128], sizes = [16, 64], strides = [1, 1]} : vector<16x192xf32> to vector<16x64xf32>
    %146 = vector.extract_strided_slice %128 {offsets = [0, 128], sizes = [16, 64], strides = [1, 1]} : vector<16x192xf32> to vector<16x64xf32>
    %147 = arith.addf %146, %24 : vector<16x64xf32>
    %148 = arith.mulf %136, %147 : vector<16x64xf32>
    %149 = arith.addf %145, %148 : vector<16x64xf32>
    %150 = math.tanh %149 : vector<16x64xf32>
    %cst_34 = arith.constant 1.000000e+00 : f32
    %151 = vector.broadcast %cst_34 : f32 to vector<16x64xf32>
    %152 = arith.subf %151, %144 : vector<16x64xf32>
    %153 = arith.mulf %152, %150 : vector<16x64xf32>
    %154 = arith.mulf %144, %106 : vector<16x64xf32>
    %155 = arith.addf %153, %154 : vector<16x64xf32>
    %c2_35 = arith.constant 2 : index
    %156 = memref.load %arg1[%c2_35] : memref<4xi32, #tpu.memory_space<smem>>
    %157 = vector.broadcast %156 : i32 to vector<16x1xi32>
    %158 = arith.cmpi eq, %27, %157 : vector<16x1xi32>
    %c1_36 = arith.constant 1 : index
    %159 = memref.load %arg1[%c1_36] : memref<4xi32, #tpu.memory_space<smem>>
    %160 = vector.broadcast %159 : i32 to vector<16x1xi32>
    %161 = arith.cmpi eq, %27, %160 : vector<16x1xi32>
    %162 = vector.extract_strided_slice %155 {offsets = [0, 0], sizes = [16, 32], strides = [1, 1]} : vector<16x64xf32> to vector<16x32xf32>
    %cst_37 = arith.constant 0.000000e+00 : f32
    %163 = vector.shape_cast %158 : vector<16x1xi1> to vector<16x1xi1>
    %164 = vector.broadcast %163 : vector<16x1xi1> to vector<16x32xi1>
    %165 = vector.broadcast %cst_37 : f32 to vector<16x32xf32>
    %166 = arith.select %164, %162, %165 : vector<16x32xi1>, vector<16x32xf32>
    %cst_38 = arith.constant dense<0.000000e+00> : vector<32xf32>
    %167 = vector.multi_reduction <add>, %166, %cst_38 [0] : vector<16x32xf32> to vector<32xf32>
    %168 = vector.shape_cast %167 : vector<32xf32> to vector<1x32xf32>
    %169 = vector.extract_strided_slice %155 {offsets = [0, 32], sizes = [16, 32], strides = [1, 1]} : vector<16x64xf32> to vector<16x32xf32>
    %cst_39 = arith.constant 0.000000e+00 : f32
    %170 = vector.shape_cast %161 : vector<16x1xi1> to vector<16x1xi1>
    %171 = vector.broadcast %170 : vector<16x1xi1> to vector<16x32xi1>
    %172 = vector.broadcast %cst_39 : f32 to vector<16x32xf32>
    %173 = arith.select %171, %169, %172 : vector<16x32xi1>, vector<16x32xf32>
    %cst_40 = arith.constant dense<0.000000e+00> : vector<32xf32>
    %174 = vector.multi_reduction <add>, %173, %cst_40 [0] : vector<16x32xf32> to vector<32xf32>
    %175 = vector.shape_cast %174 : vector<32xf32> to vector<1x32xf32>
    %176 = vector.extract_strided_slice %20 {offsets = [48, 0], sizes = [16, 192], strides = [1, 1]} : vector<64x192xf32> to vector<16x192xf32>
    %cst_41 = arith.constant dense<0.000000e+00> : vector<16x192xf32>
    %177 = tpu.matmul %155, %21, %cst_41 {dimension_numbers = #tpu.dot_dimension_numbers<[1], [0], [0], [1], [0, 0, 1, 1], [], []>} : vector<16x64xf32>, vector<64x192xf32>, vector<16x192xf32> -> vector<16x192xf32>
    %178 = vector.extract_strided_slice %176 {offsets = [0, 0], sizes = [16, 64], strides = [1, 1]} : vector<16x192xf32> to vector<16x64xf32>
    %179 = vector.extract_strided_slice %177 {offsets = [0, 0], sizes = [16, 64], strides = [1, 1]} : vector<16x192xf32> to vector<16x64xf32>
    %180 = arith.addf %178, %179 : vector<16x64xf32>
    %181 = arith.negf %180 : vector<16x64xf32>
    %182 = math.exp %181 : vector<16x64xf32>
    %cst_42 = arith.constant 1.000000e+00 : f32
    %183 = vector.broadcast %cst_42 : f32 to vector<16x64xf32>
    %184 = arith.addf %183, %182 : vector<16x64xf32>
    %185 = arith.divf %183, %184 : vector<16x64xf32>
    %186 = vector.extract_strided_slice %176 {offsets = [0, 64], sizes = [16, 64], strides = [1, 1]} : vector<16x192xf32> to vector<16x64xf32>
    %187 = vector.extract_strided_slice %177 {offsets = [0, 64], sizes = [16, 64], strides = [1, 1]} : vector<16x192xf32> to vector<16x64xf32>
    %188 = arith.addf %186, %187 : vector<16x64xf32>
    %189 = arith.negf %188 : vector<16x64xf32>
    %190 = math.exp %189 : vector<16x64xf32>
    %cst_43 = arith.constant 1.000000e+00 : f32
    %191 = vector.broadcast %cst_43 : f32 to vector<16x64xf32>
    %192 = arith.addf %191, %190 : vector<16x64xf32>
    %193 = arith.divf %191, %192 : vector<16x64xf32>
    %194 = vector.extract_strided_slice %176 {offsets = [0, 128], sizes = [16, 64], strides = [1, 1]} : vector<16x192xf32> to vector<16x64xf32>
    %195 = vector.extract_strided_slice %177 {offsets = [0, 128], sizes = [16, 64], strides = [1, 1]} : vector<16x192xf32> to vector<16x64xf32>
    %196 = arith.addf %195, %24 : vector<16x64xf32>
    %197 = arith.mulf %185, %196 : vector<16x64xf32>
    %198 = arith.addf %194, %197 : vector<16x64xf32>
    %199 = math.tanh %198 : vector<16x64xf32>
    %cst_44 = arith.constant 1.000000e+00 : f32
    %200 = vector.broadcast %cst_44 : f32 to vector<16x64xf32>
    %201 = arith.subf %200, %193 : vector<16x64xf32>
    %202 = arith.mulf %201, %199 : vector<16x64xf32>
    %203 = arith.mulf %193, %155 : vector<16x64xf32>
    %204 = arith.addf %202, %203 : vector<16x64xf32>
    %c3_45 = arith.constant 3 : index
    %205 = memref.load %arg1[%c3_45] : memref<4xi32, #tpu.memory_space<smem>>
    %206 = vector.broadcast %205 : i32 to vector<16x1xi32>
    %207 = arith.cmpi eq, %27, %206 : vector<16x1xi32>
    %c0_46 = arith.constant 0 : index
    %208 = memref.load %arg1[%c0_46] : memref<4xi32, #tpu.memory_space<smem>>
    %209 = vector.broadcast %208 : i32 to vector<16x1xi32>
    %210 = arith.cmpi eq, %27, %209 : vector<16x1xi32>
    %211 = vector.extract_strided_slice %204 {offsets = [0, 0], sizes = [16, 32], strides = [1, 1]} : vector<16x64xf32> to vector<16x32xf32>
    %cst_47 = arith.constant 0.000000e+00 : f32
    %212 = vector.shape_cast %207 : vector<16x1xi1> to vector<16x1xi1>
    %213 = vector.broadcast %212 : vector<16x1xi1> to vector<16x32xi1>
    %214 = vector.broadcast %cst_47 : f32 to vector<16x32xf32>
    %215 = arith.select %213, %211, %214 : vector<16x32xi1>, vector<16x32xf32>
    %cst_48 = arith.constant dense<0.000000e+00> : vector<32xf32>
    %216 = vector.multi_reduction <add>, %215, %cst_48 [0] : vector<16x32xf32> to vector<32xf32>
    %217 = vector.shape_cast %216 : vector<32xf32> to vector<1x32xf32>
    %218 = vector.extract_strided_slice %204 {offsets = [0, 32], sizes = [16, 32], strides = [1, 1]} : vector<16x64xf32> to vector<16x32xf32>
    %cst_49 = arith.constant 0.000000e+00 : f32
    %219 = vector.shape_cast %210 : vector<16x1xi1> to vector<16x1xi1>
    %220 = vector.broadcast %219 : vector<16x1xi1> to vector<16x32xi1>
    %221 = vector.broadcast %cst_49 : f32 to vector<16x32xf32>
    %222 = arith.select %220, %218, %221 : vector<16x32xi1>, vector<16x32xf32>
    %cst_50 = arith.constant dense<0.000000e+00> : vector<32xf32>
    %223 = vector.multi_reduction <add>, %222, %cst_50 [0] : vector<16x32xf32> to vector<32xf32>
    %224 = vector.shape_cast %223 : vector<32xf32> to vector<1x32xf32>
    %225 = tpu.concatenate %70, %119, %168, %217 in 0 : vector<1x32xf32>, vector<1x32xf32>, vector<1x32xf32>, vector<1x32xf32> -> vector<4x32xf32>
    %226 = tpu.concatenate %224, %175, %126, %77 in 0 : vector<1x32xf32>, vector<1x32xf32>, vector<1x32xf32>, vector<1x32xf32> -> vector<4x32xf32>
    %227 = tpu.concatenate %225, %226 in 1 : vector<4x32xf32>, vector<4x32xf32> -> vector<4x64xf32>
    %c0_51 = arith.constant 0 : index
    %c0_52 = arith.constant 0 : index
    %228 = vector.load %arg8[%c0_51, %c0_52] : memref<64x16xf32, #tpu.memory_space<vmem>>, vector<64x16xf32>
    %cst_53 = arith.constant dense<0.000000e+00> : vector<4x16xf32>
    %229 = tpu.matmul %227, %228, %cst_53 {dimension_numbers = #tpu.dot_dimension_numbers<[1], [0], [0], [1], [0, 0, 1, 1], [], []>} : vector<4x64xf32>, vector<64x16xf32>, vector<4x16xf32> -> vector<4x16xf32>
    %c0_54 = arith.constant 0 : index
    %c0_55 = arith.constant 0 : index
    %c0_56 = arith.constant 0 : index
    %230 = vector.load %arg9[%c0_54, %c0_55, %c0_56] : memref<1x4x16xf32, #tpu.memory_space<vmem>>, vector<1x4x16xf32>
    %231 = vector.shape_cast %230 : vector<1x4x16xf32> to vector<4x16xf32>
    %232 = vector.shape_cast %229 : vector<4x16xf32> to vector<1x4x16xf32>
    tpu.vector_store %arg9[%c0_54, %c0_55, %c0_56], %232 {strides = array<i32>} : memref<1x4x16xf32, #tpu.memory_space<vmem>>, vector<1x4x16xf32>,
    return
  }
  func.func @transform_0(%arg0: i32, %arg1: memref<4xi32, #tpu.memory_space<smem>>) -> (i32, i32, i32) {
    %c0_i32 = arith.constant 0 : i32
    %c0_i32_0 = arith.constant 0 : i32
    %c0_i32_1 = arith.constant 0 : i32
    return %c0_i32, %arg0, %c0_i32_0 : i32, i32, i32
  }
  func.func @transform_1(%arg0: i32, %arg1: memref<4xi32, #tpu.memory_space<smem>>) -> (i32, i32) {
    %c0_i32 = arith.constant 0 : i32
    %c0_i32_0 = arith.constant 0 : i32
    %c0_i32_1 = arith.constant 0 : i32
    return %c0_i32, %c0_i32_0 : i32, i32
  }
  func.func @transform_2(%arg0: i32, %arg1: memref<4xi32, #tpu.memory_space<smem>>) -> (i32, i32) {
    %c0_i32 = arith.constant 0 : i32
    %c0_i32_0 = arith.constant 0 : i32
    %c0_i32_1 = arith.constant 0 : i32
    return %c0_i32, %c0_i32_0 : i32, i32
  }
  func.func @transform_3(%arg0: i32, %arg1: memref<4xi32, #tpu.memory_space<smem>>) -> (i32, i32) {
    %c0_i32 = arith.constant 0 : i32
    %c0_i32_0 = arith.constant 0 : i32
    %c0_i32_1 = arith.constant 0 : i32
    return %c0_i32, %c0_i32_0 : i32, i32
  }
  func.func @transform_4(%arg0: i32, %arg1: memref<4xi32, #tpu.memory_space<smem>>) -> (i32, i32) {
    %c0_i32 = arith.constant 0 : i32
    %c0_i32_0 = arith.constant 0 : i32
    %c0_i32_1 = arith.constant 0 : i32
    return %c0_i32, %c0_i32_0 : i32, i32
  }
  func.func @transform_5(%arg0: i32, %arg1: memref<4xi32, #tpu.memory_space<smem>>) -> (i32, i32) {
    %c0_i32 = arith.constant 0 : i32
    %c0_i32_0 = arith.constant 0 : i32
    %c0_i32_1 = arith.constant 0 : i32
    return %c0_i32, %c0_i32_0 : i32, i32
  }
  func.func @transform_6(%arg0: i32, %arg1: memref<4xi32, #tpu.memory_space<smem>>) -> (i32, i32) {
    %c0_i32 = arith.constant 0 : i32
    %c0_i32_0 = arith.constant 0 : i32
    %c0_i32_1 = arith.constant 0 : i32
    return %c0_i32, %c0_i32_0 : i32, i32
  }
  func.func @transform_7(%arg0: i32, %arg1: memref<4xi32, #tpu.memory_space<smem>>) -> (i32, i32, i32) {
    %c0_i32 = arith.constant 0 : i32
    %c0_i32_0 = arith.constant 0 : i32
    %c0_i32_1 = arith.constant 0 : i32
    return %arg0, %c0_i32, %c0_i32_0 : i32, i32, i32
  }
}

</mosaic_0001>

<bundles_post_ra>
// kernel: encoder_forward.1
= control target key start
LH: loop header
LB: loop body
LE: loop exit
PB: predicated region body
PF: predicated region fallthrough
CT: control target
= control target key end

     0   :  { %s1995_s0 = inlined_call_operand.vmem [shape: s32[4], index: 0, kind: input, shape index: {}]   ;;  %s1996_s1 = inlined_call_operand.vmem [shape: s32[4,16,1], index: 1, kind: input, shape index: {}]   ;;  %s1997_s2 = inlined_call_operand.vmem [shape: f32[50,32], index: 2, kind: input, shape index: {}]   ;;  %s1998_s3 = inlined_call_operand.vmem [shape: f32[64,192], index: 3, kind: input, shape index: {}]   ;;  %s1999_s4 = inlined_call_operand.vmem [shape: f32[64,192], index: 4, kind: input, shape index: {}]   ;;  %s2000_s5 = inlined_call_operand.vmem [shape: f32[1,192], index: 5, kind: input, shape index: {}]   ;;  %s2001_s6 = inlined_call_operand.vmem [shape: f32[1,64], index: 6, kind: input, shape index: {}]   ;;  %s2002_s7 = inlined_call_operand.vmem [shape: f32[64,16], index: 7, kind: input, shape index: {}]   ;;  %s2003_s8 = inlined_call_operand.vmem [shape: f32[1,4,16], index: 8, kind: output, shape index: {}]  }
   0x1   :  { %s13_s29 = sshll.u32 %s1995_s0, 4  ;;  %s14_s29 = int_to_ptr.vmem [resolvable:$true] %s13_s29 }
   0x2   :  { %s1357_s30 = scalar_lea.vmem %s14_s29, 16  ;;  %p1362_p1 = scmp.lt.s32.totalorder %s14_s29, %s14_s29 }
   0x3   :  { %p1358_p0 = scmp.ne.s32.totalorder %s14_s29, %s1357_s30  ;;  %p1363_p2 = scmp.lt.s32.totalorder %s1357_s30, %s1357_s30 }
   0x5   :  { %p1364_p3 = por %p1363_p2, %p1362_p1 }
   0x7   :  { %p1365_p4 = pnand %p1364_p3, %p1358_p0 }
   0x9   :  { %1368 = shalt.err (!%p1365_p4)  }
   0xa   :  { %s1371_s9 = smov [#allocation3]  }
   0xb   :  { %16 = dma.vmem_to_smem %s14_s29, 16, %s1371_s9, [#allocation2] }
   0xc   :  { %1369 = dma.done.wait [#allocation2], 16 }
   0xd   :  { %1370 = vsyncadd [#allocation2], 4294967280 }
   0xe   :  { %18 = sfence }
   0xf   :  { %v36_v0 = vld [vmem:[%s1996_s1 + $0x10] sm:$0xff]  ;;  %v34_v1 = vld [vmem:[%s1996_s1] sm:$0xff]  ;;  %vm124_vm0 = vcmask 1041408   ;;  %v1372_v2 = vmov 0   ;;  %v37_v4 = vld [vmem:[%s1996_s1 + $0x18] sm:$0xff]  ;;  %v1373_v7 = vmov 0.0   ;;  %v42_v17 = vlaneseq }
  0x10   :  { %1308 = vset.pattern.permute.xlu1 %v1372_v2  ;;  %1307 = vset.pattern.permute.xlu0 %v1372_v2  ;;  %v98_v3 = vld [vmem:[%s1997_s2 + $0x30] sm:$0x3]  ;;  %v35_v5 = vld [vmem:[%s1996_s1 + $0x8] sm:$0xff]  ;;  %v96_v8 = vld [vmem:[%s1997_s2 + $0x20] sm:$0xff]  ;;  %vm99_vm1 = vcmask 408576   ;;  %vm302_vm10 = vcmask 523264  }
  0x11   :  { %51 = vperm.xlu1 %1308, %v36_v0   ;;  %45 = vperm.xlu0 %1307, %v34_v1   ;;  %v97_v6 = vld [vmem:[%s1997_s2 + $0x28] sm:$0xff]  ;;  %v38_v10 = vld [vmem:[%s1996_s1 + $0x20] sm:$0xff]  ;;  %v95_v11 = vld [vmem:[%s1997_s2 + $0x18] sm:$0xff]  ;;  %v43_v18 = vand.u32 127, %v42_v17  ;;  %vm265_vm11 = vcmask 261120   ;;  %s1221_s17 = sld [smem:[#allocation3 + $0x1]] }
  0x12   :  { %1256 = vmatprep.subr.msk.mxu0 %vm124_vm0, %v98_v3  ;;  %391 = vmatprep.mubr.f32.mxu1 %v1373_v7  ;;  %v39_v9 = vld [vmem:[%s1996_s1 + $0x28] sm:$0xff]  ;;  %v94_v12 = vld [vmem:[%s1997_s2 + $0x10] sm:$0xff]  ;;  %v41_v13 = vld [vmem:[%s1996_s1 + $0x38] sm:$0xff]  ;;  %s587_s18 = sld [smem:[#allocation3]] }
  0x13   :  { %1257 = vmatpush3.msk.msra.mxu0 %vm124_vm0, %v98_v3  ;;  %v40_v14 = vld [vmem:[%s1996_s1 + $0x30] sm:$0xff]  ;;  %v93_v15 = vld [vmem:[%s1997_s2 + $0x8] sm:$0xff]  ;;  %v92_v16 = vld [vmem:[%s1997_s2] sm:$0xff]  ;;  %s1222_s19 = sld [smem:[#allocation3 + $0x2]] }
  0x14   :  { %1258 = vmatprep.subr.mxu0 %v97_v6  ;;  %v289_v35 = vld [vmem:[%s1998_s3 + $0x78] sm:$0xff]  ;;  %v288_v37 = vld [vmem:[%s1998_s3 + $0x70] sm:$0xff]  ;;  %v287_v39 = vld [vmem:[%s1998_s3 + $0x68] sm:$0xff]  ;;  %s1216_s20 = sld [smem:[#allocation3 + $0x3]] }
  0x15   :  { %54 = vperm.xlu1 %1308, %v37_v4   ;;  %48 = vperm.xlu0 %1307, %v35_v5   ;;  %v1497_v36 = vld [vmem:[%s1999_s4 + $0x78] sm:$0xff]  ;;  %v1506_v38 = vld [vmem:[%s1999_s4 + $0x70] sm:$0xff]  ;;  %v1514_v40 = vld [vmem:[%s1999_s4 + $0x68] sm:$0xff] }
  0x16   :  { %1259 = vmatpush3.msra.mxu0 %v97_v6  ;;  %343 = vmatprep.subr.mxu1 %v289_v35  ;;  %v286_v41 = vld [vmem:[%s1998_s3 + $0x60] sm:$0xff]  ;;  %v285_v43 = vld [vmem:[%s1998_s3 + $0x58] sm:$0xff]  ;;  %v284_v45 = vld [vmem:[%s1998_s3 + $0x50] sm:$0xff] }
  0x17   :  { %1260 = vmatprep.subr.mxu0 %v96_v8  ;;  %344 = vmatpush1.msra.mxu1 %v288_v37  ;;  %v1523_v42 = vld [vmem:[%s1999_s4 + $0x60] sm:$0xff]  ;;  %v1532_v44 = vld [vmem:[%s1999_s4 + $0x58] sm:$0xff]  ;;  %v1540_v46 = vld [vmem:[%s1999_s4 + $0x50] sm:$0xff] }
  0x18   :  { %1261 = vmatpush3.msra.mxu0 %v96_v8  ;;  %345 = vmatprep.subr.mxu1 %v287_v39  ;;  %v283_v47 = vld [vmem:[%s1998_s3 + $0x48] sm:$0xff]  ;;  %v282_v49 = vld [vmem:[%s1998_s3 + $0x40] sm:$0xff]  ;;  %v281_v51 = vld [vmem:[%s1998_s3 + $0x38] sm:$0xff] }
  0x19   :  { %60 = vperm.xlu1 %1308, %v39_v9   ;;  %57 = vperm.xlu0 %1307, %v38_v10   ;;  %v1549_v48 = vld [vmem:[%s1999_s4 + $0x48] sm:$0xff]  ;;  %v1558_v50 = vld [vmem:[%s1999_s4 + $0x40] sm:$0xff]  ;;  %v1567_v52 = vld [vmem:[%s1999_s4 + $0x38] sm:$0xff] }
  0x1a   :  { %1262 = vmatprep.subr.mxu0 %v95_v11  ;;  %346 = vmatpush1.msra.mxu1 %v286_v41  ;;  %v280_v53 = vld [vmem:[%s1998_s3 + $0x30] sm:$0xff]  ;;  %v279_v55 = vld [vmem:[%s1998_s3 + $0x28] sm:$0xff]  ;;  %v278_v57 = vld [vmem:[%s1998_s3 + $0x20] sm:$0xff] }
  0x1b   :  { %1263 = vmatpush3.msra.mxu0 %v95_v11  ;;  %347 = vmatprep.subr.mxu1 %v285_v43  ;;  %v1576_v54 = vld [vmem:[%s1999_s4 + $0x30] sm:$0xff]  ;;  %v1585_v56 = vld [vmem:[%s1999_s4 + $0x28] sm:$0xff]  ;;  %v1594_v58 = vld [vmem:[%s1999_s4 + $0x20] sm:$0xff] }
  0x1c   :  { %1264 = vmatprep.subr.mxu0 %v94_v12  ;;  %348 = vmatpush1.msra.mxu1 %v284_v45  ;;  %v277_v59 = vld [vmem:[%s1998_s3 + $0x18] sm:$0xff]  ;;  %v276_v61 = vld [vmem:[%s1998_s3 + $0x10] sm:$0xff]  ;;  %v275_v0 = vld [vmem:[%s1998_s3 + $0x8] sm:$0xff] }
  0x1d   :  { %66 = vperm.xlu1 %1308, %v41_v13   ;;  %63 = vperm.xlu0 %1307, %v40_v14   ;;  %v1603_v60 = vld [vmem:[%s1999_s4 + $0x18] sm:$0xff]  ;;  %v1614_v62 = vld [vmem:[%s1999_s4 + $0x10] sm:$0xff]  ;;  %v1625_v1 = vld [vmem:[%s1999_s4 + $0x8] sm:$0xff] }
  0x1e   :  { %1265 = vmatpush3.msra.mxu0 %v94_v12  ;;  %349 = vmatprep.subr.mxu1 %v283_v47  ;;  %v274_v2 = vld [vmem:[%s1998_s3] sm:$0xff]  ;;  %s1374_s3 = smov 32  }
  0x1f   :  { %1266 = vmatprep.subr.mxu0 %v93_v15  ;;  %350 = vmatpush1.msra.mxu1 %v282_v49  ;;  %v1634_v3 = vld [vmem:[%s1999_s4] sm:$0xff] }
  0x20   :  { %1267 = vmatpush3.msra.mxu0 %v93_v15  ;;  %351 = vmatprep.subr.mxu1 %v281_v51  ;;  %v1716_v37 = vld [vmem:[%s2001_s6] ss:$0 sm:$0xff]  ;;  %s1375_s6 = smov 64  }
  0x21   :  { %1268 = vmatprep.subr.mxu0 %v92_v16  ;;  %352 = vmatpush1.msra.mxu1 %v280_v53 }
  0x22   :  { %1269 = vmatpush3.msra.mxu0 %v92_v16  ;;  %353 = vmatprep.subr.mxu1 %v279_v55  ;;  %v1702_v16 = vshrl.u32 %v42_v17, 7 }
  0x23   :  { %488 = vmatprep.subr.mxu0 %v1497_v36  ;;  %354 = vmatpush1.msra.mxu1 %v278_v57 }
  0x24   :  { %355 = vmatprep.subr.mxu1 %v277_v59 }
  0x25   :  { %356 = vmatpush1.msra.mxu1 %v276_v61 }
  0x26   :  { %357 = vmatprep.subr.mxu1 %v275_v0 }
  0x27   :  { %358 = vmatpush1.msra.mxu1 %v274_v2 }
  0x28   :  { %816 = vmatprep.subr.mxu1 %v1497_v36 }
  0x8c   :  { %v52_v19 = vpop.permute.xlu1 %51  ;;  %v46_v20 = vpop.permute.xlu0 %45 }
  0x8d   :  { %vm68_vm2 = vcmp.eq.s32.totalorder %v46_v20, %v43_v18  ;;  %vm70_vm3 = vcmp.eq.s32.totalorder %v52_v19, %v43_v18  ;;  %v290_v19 = vld [vmem:[%s2000_s5] sm:$0x3] }
  0x8e   :  { %v1188_v21 = vsel %vm68_vm2, 1.0, %v1373_v7  ;;  %v1190_v24 = vsel %vm70_vm3, 1.0, %v1373_v7 }
  0x8f   :  { %1270 = vmatprep.mubr.msk.f32.mxu0 %vm99_vm1, %v1188_v21 }
  0x90   :  { %v55_v22 = vpop.permute.xlu1 %54  ;;  %v49_v23 = vpop.permute.xlu0 %48 }
  0x91   :  { %vm69_vm4 = vcmp.eq.s32.totalorder %v49_v23, %v43_v18  ;;  %vm71_vm5 = vcmp.eq.s32.totalorder %v55_v22, %v43_v18 }
  0x92   :  { %v1189_v25 = vsel %vm69_vm4, 1.0, %v1373_v7  ;;  %v1191_v28 = vsel %vm71_vm5, 1.0, %v1373_v7 }
  0x93   :  { %1271 = vmatmul.mubr.msk.f32.vlgmr.msra.gmra.mxu0 %vm99_vm1, %v1189_v25 }
  0x94   :  { %v61_v26 = vpop.permute.xlu1 %60  ;;  %1273 = vmatprep.mubr.msk.f32.mxu0 %vm99_vm1, %v1190_v24  ;;  %v58_v27 = vpop.permute.xlu0 %57  ;;  %489 = vmatpush1.msra.mxu0 %v1506_v38 }
  0x95   :  { %vm72_vm6 = vcmp.eq.s32.totalorder %v58_v27, %v43_v18  ;;  %vm73_vm7 = vcmp.eq.s32.totalorder %v61_v26, %v43_v18  ;;  %490 = vmatprep.subr.mxu0 %v1514_v40 }
  0x96   :  { %v1192_v29 = vsel %vm72_vm6, 1.0, %v1373_v7  ;;  %v1193_v32 = vsel %vm73_vm7, 1.0, %v1373_v7  ;;  %491 = vmatpush1.msra.mxu0 %v1523_v42  ;;  %vm617_vm6 = vcmask 1048320   ;;  %vm1376_vm7 = vmmov 0  }
  0x97   :  { %1274 = vmatmul.mubr.msk.f32.gmra.mxu0 %vm99_vm1, %v1191_v28  ;;  %492 = vmatprep.subr.mxu0 %v1532_v44 }
  0x98   :  { %v67_v30 = vpop.permute.xlu1 %66  ;;  %1276 = vmatprep.mubr.msk.f32.mxu0 %vm99_vm1, %v1192_v29  ;;  %v64_v31 = vpop.permute.xlu0 %63  ;;  %493 = vmatpush1.msra.mxu0 %v1540_v46 }
  0x99   :  { %vm74_vm8 = vcmp.eq.s32.totalorder %v64_v31, %v43_v18  ;;  %vm75_vm9 = vcmp.eq.s32.totalorder %v67_v30, %v43_v18  ;;  %494 = vmatprep.subr.mxu0 %v1549_v48  ;;  %v294_v18 = vsub.s32 0, %v1702_v16 }
  0x9a   :  { %v1194_v33 = vsel %vm74_vm8, 1.0, %v1373_v7  ;;  %v1195_v34 = vsel %vm75_vm9, 1.0, %v1373_v7  ;;  %495 = vmatpush1.msra.mxu0 %v1558_v50  ;;  %vm1084_vm8 = vcmask 1040384   ;;  %vm1087_vm9 = vcmask 1042432  }
  0x9b   :  { %1277 = vmatmul.mubr.msk.f32.gmra.mxu0 %vm99_vm1, %v1193_v32  ;;  %496 = vmatprep.subr.mxu0 %v1567_v52  ;;  %v1708_v20 = vrot.slane %v290_v19, %v294_v18 }
  0x9c   :  { %1279 = vmatprep.mubr.msk.f32.mxu0 %vm99_vm1, %v1194_v33  ;;  %497 = vmatpush1.msra.mxu0 %v1576_v54 }
  0x9d   :  { %498 = vmatprep.subr.mxu0 %v1585_v56 }
  0x9e   :  { %499 = vmatpush1.msra.mxu0 %v1594_v58 }
  0x9f   :  { %1280 = vmatmul.mubr.msk.f32.gmra.mxu0 %vm99_vm1, %v1195_v34  ;;  %500 = vmatprep.subr.mxu0 %v1603_v60  ;;  %vm601_vm1 = vcmask 785920  }
  0xa0   :  { %536 = vmatprep.mubr.f32.mxu0 %v1373_v7  ;;  %501 = vmatpush1.msra.mxu0 %v1614_v62 }
  0xa1   :  { %502 = vmatprep.subr.mxu0 %v1625_v1 }
  0xa2   :  { %503 = vmatpush1.msra.mxu0 %v1634_v3 }
  0xa3   :  { %537 = vmatmul.mubr.f32.vlgmr.msra.gmra.mxu0 %v1373_v7  ;;  %653 = vmatprep.subr.mxu0 %v1497_v36 }
  0xa4   :  { %542 = vmatprep.mubr.f32.mxu0 %v1373_v7  ;;  %654 = vmatpush1.msra.mxu0 %v1506_v38 }
  0xa5   :  { %655 = vmatprep.subr.mxu0 %v1514_v40 }
  0xa6   :  { %656 = vmatpush1.msra.mxu0 %v1523_v42 }
  0xa7   :  { %543 = vmatmul.mubr.f32.gmra.mxu0 %v1373_v7  ;;  %657 = vmatprep.subr.mxu0 %v1532_v44 }
  0xa8   :  { %658 = vmatpush1.msra.mxu0 %v1540_v46  ;;  %701 = vmatprep.mubr.f32.mxu0 %v1373_v7 }
  0xa9   :  { %659 = vmatprep.subr.mxu0 %v1549_v48 }
  0xaa   :  { %660 = vmatpush1.msra.mxu0 %v1558_v50 }
  0xab   :  { %661 = vmatprep.subr.mxu0 %v1567_v52 }
  0xac   :  { %662 = vmatpush1.msra.mxu0 %v1576_v54 }
  0xad   :  { %663 = vmatprep.subr.mxu0 %v1585_v56 }
  0xae   :  { %664 = vmatpush1.msra.mxu0 %v1594_v58 }
  0xaf   :  { %665 = vmatprep.subr.mxu0 %v1603_v60 }
  0xb0   :  { %666 = vmatpush1.msra.mxu0 %v1614_v62 }
  0xb1   :  { %667 = vmatprep.subr.mxu0 %v1625_v1 }
  0xb2   :  { %668 = vmatpush1.msra.mxu0 %v1634_v3 }
  0xb3   :  { %963 = vmatprep.subr.mxu0 %v1497_v36  ;;  %v298_v36 = vsub.s32 1, %v1702_v16 }
  0xb5   :  { %v1718_v39 = vrot.slane %v290_v19, %v298_v36 }
 0x153   :  { %v1616_v63 = vpop.f32.mrf.mxu0 }
 0x155   :  { %v1636_v4 = vpop.f32.mrf.mxu0 }
 0x157   :  { %v1641_v5 = vpop.f32.mrf.mxu0 }
 0x159   :  { %v1647_v6 = vpop.f32.mrf.mxu0 }
 0x15b   :  { %v1652_v8 = vpop.f32.mrf.mxu0 }
 0x15d   :  { %v1657_v9 = vpop.f32.mrf.mxu0 }
 0x15f   :  { %v1661_v10 = vpop.f32.mrf.mxu0 }
 0x160   :  { %243 = vrot.lane.b32.xlu1 %v1661_v10, %s1374_s3 }
 0x161   :  { %v1667_v11 = vpop.f32.mrf.mxu0 }
 0x162   :  { %241 = vrot.lane.b32.xlu0 %v1667_v11, %s1374_s3 }
 0x163   :  { %v538_v21 = vpop.f32.mrf.mxu0 }
 0x165   :  { %v540_v25 = vpop.f32.mrf.mxu0 }
 0x166   :  { %v563_v41 = vadd.f32 %v1716_v37, %v540_v25 }
 0x167   :  { %v544_v29 = vpop.f32.mrf.mxu0 }
 0x169   :  { %v546_v45 = vpop.f32.mrf.mxu0 }
 0x16a   :  { %v564_v55 = vadd.f32 %v1716_v37, %v546_v45 }
 0x1d2   :  { %v244_v14 = vpop.permute.xlu1 %243 }
 0x1d3   :  { %v267_v15 = vsel %vm265_vm11, %v1616_v63, %v244_v14 }
 0x1d4   :  { %v242_v12 = vpop.permute.xlu0 %241 }
 0x1d5   :  { %v266_v13 = vsel %vm265_vm11, %v1636_v4, %v242_v12 }
 0x1d6   :  { %1205 = vmatmul.mubr.msk.f32.vlgmr.msra.gmra.mxu1 %vm302_vm10, %v266_v13 }
 0x1d7   :  { %397 = vmatprep.mubr.f32.mxu1 %v1373_v7  ;;  %817 = vmatpush1.msra.mxu1 %v1506_v38 }
 0x1d8   :  { %818 = vmatprep.subr.mxu1 %v1514_v40 }
 0x1d9   :  { %819 = vmatpush1.msra.mxu1 %v1523_v42 }
 0x1da   :  { %1206 = vmatmul.mubr.msk.f32.gmra.mxu1 %vm302_vm10, %v267_v15  ;;  %820 = vmatprep.subr.mxu1 %v1532_v44 }
 0x1db   :  { %403 = vmatprep.mubr.f32.mxu1 %v1373_v7  ;;  %821 = vmatpush1.msra.mxu1 %v1540_v46 }
 0x1dc   :  { %822 = vmatprep.subr.mxu1 %v1549_v48 }
 0x1dd   :  { %823 = vmatpush1.msra.mxu1 %v1558_v50 }
 0x1de   :  { %824 = vmatprep.subr.mxu1 %v1567_v52 }
 0x1df   :  { %825 = vmatpush1.msra.mxu1 %v1576_v54 }
 0x1e0   :  { %826 = vmatprep.subr.mxu1 %v1585_v56 }
 0x1e1   :  { %827 = vmatpush1.msra.mxu1 %v1594_v58 }
 0x1e2   :  { %828 = vmatprep.subr.mxu1 %v1603_v60 }
 0x1e3   :  { %829 = vmatpush1.msra.mxu1 %v1614_v62 }
 0x1e4   :  { %830 = vmatprep.subr.mxu1 %v1625_v1 }
 0x1e5   :  { %831 = vmatpush1.msra.mxu1 %v1634_v3 }
 0x1e6   :  { %1282 = vmatprep.subr.mxu1 %v1373_v7 }
 0x296   :  { %v393_v22 = vpop.f32.mrf.mxu1 }
 0x297   :  { %v394_v23 = vadd.f32 %v393_v22, %v1708_v20 }
 0x298   :  { %v395_v24 = vpop.f32.mrf.mxu1 }
 0x299   :  { %v549_v26 = vadd.f32 %v538_v21, %v394_v23  ;;  %v396_v47 = vadd.f32 %v395_v24, %v1718_v39 }
 0x29a   :  { %v399_v27 = vpop.f32.mrf.mxu1 }
 0x29b   :  { %v1214_v28 = vmul.f32 -1.442695, %v549_v26  ;;  %v400_v17 = vadd.f32 %v399_v27, %v1708_v20 }
 0x29c   :  { %v401_v51 = vpop.f32.mrf.mxu1 }
 0x29d   :  { %1309 = vpow2.f32 %v1214_v28  ;;  %v550_v30 = vadd.f32 %v544_v29, %v400_v17  ;;  %v402_v59 = vadd.f32 %v401_v51, %v1718_v39 }
 0x29f   :  { %v1215_v31 = vmul.f32 -1.442695, %v550_v30 }
 0x2a1   :  { %1311 = vpow2.f32 %v1215_v31 }
 0x2aa   :  { %v1310_v32 = vpop.eup %1309 }
 0x2ab   :  { %v557_v33 = vadd.f32 1.0, %v1310_v32 }
 0x2ad   :  { %1313 = vrcp.f32 %v557_v33 }
 0x2ae   :  { %v1312_v34 = vpop.eup %1311 }
 0x2af   :  { %v558_v35 = vadd.f32 1.0, %v1312_v34 }
 0x2b1   :  { %1315 = vrcp.f32 %v558_v35 }
 0x2ba   :  { %v1314_v43 = vpop.eup %1313 }
 0x2bb   :  { %v565_v49 = vmul.f32 %v1314_v43, %v563_v41  ;;  %v571_v13 = vsub.f32 1.0, %v1314_v43  ;;  %v583_v15 = vmul.f32 0.0, %v1314_v43 }
 0x2bd   :  { %v567_v53 = vadd.f32 %v565_v49, %v396_v47 }
 0x2be   :  { %v1316_v57 = vpop.eup %1315 }
 0x2bf   :  { %1317 = vtanh.f32 %v567_v53  ;;  %v566_v61 = vmul.f32 %v1316_v57, %v564_v55  ;;  %v572_v21 = vsub.f32 1.0, %v1316_v57  ;;  %v584_v25 = vmul.f32 0.0, %v1316_v57 }
 0x2c1   :  { %v568_v0 = vadd.f32 %v566_v61, %v402_v59 }
 0x2c3   :  { %1319 = vtanh.f32 %v568_v0 }
 0x2cc   :  { %v1318_v2 = vpop.eup %1317 }
 0x2cd   :  { %575 = vrot.lane.b32.xlu0 %v1318_v2, %s1375_s6 }
 0x2d0   :  { %v1320_v12 = vpop.eup %1319 }
 0x2d1   :  { %245 = vrot.lane.b32.xlu0 %v1657_v9, %s1374_s3  ;;  %577 = vrot.lane.b32.xlu1 %v1320_v12, %s1375_s6 }
 0x2d5   :  { %247 = vrot.lane.b32.xlu0 %v1652_v8, %s1374_s3 }
 0x33f   :  { %v576_v14 = vpop.permute.xlu0 %575 }
 0x340   :  { %v581_v18 = vmul.f32 %v576_v14, %v571_v13 }
 0x342   :  { %v1730_v19 = vadd.f32 %v583_v15, %v581_v18 }
 0x343   :  { %v246_v22 = vpop.permute.xlu0 %245  ;;  %v578_v23 = vpop.permute.xlu1 %577 }
 0x344   :  { %v268_v24 = vsel %vm265_vm11, %v1647_v6, %v246_v22  ;;  %v582_v26 = vmul.f32 %v578_v23, %v572_v21  ;;  %629 = vrot.lane.b32.xlu1 %v1730_v19, %s1375_s6 }
 0x345   :  { %1207 = vmatmul.mubr.msk.f32.gmra.mxu1 %vm302_vm10, %v268_v24 }
 0x346   :  { %v1737_v27 = vadd.f32 %v584_v25, %v582_v26  ;;  %409 = vmatprep.mubr.f32.mxu1 %v1373_v7 }
 0x347   :  { %v248_v28 = vpop.permute.xlu0 %247 }
 0x348   :  { %v269_v17 = vsel %vm265_vm11, %v1641_v5, %v248_v28  ;;  %631 = vrot.lane.b32.xlu1 %v1737_v27, %s1375_s6 }
 0x349   :  { %1208 = vmatmul.mubr.msk.f32.gmra.mxu1 %vm302_vm10, %v269_v17 }
 0x34a   :  { %415 = vmatprep.mubr.f32.mxu1 %v1373_v7 }
 0x3b6   :  { %v630_v29 = vpop.permute.xlu1 %629 }
 0x3b7   :  { %1217 = vmatmul.mubr.msk.f32.vlgmr.msra.gmra.mxu0 %vm302_vm10, %v630_v29 }
 0x3b8   :  { %707 = vmatprep.mubr.f32.mxu0 %v1373_v7  ;;  %964 = vmatpush1.msra.mxu0 %v1506_v38 }
 0x3b9   :  { %965 = vmatprep.subr.mxu0 %v1514_v40 }
 0x3ba   :  { %v632_v30 = vpop.permute.xlu1 %631  ;;  %966 = vmatpush1.msra.mxu0 %v1523_v42 }
 0x3bb   :  { %1218 = vmatmul.mubr.msk.f32.gmra.mxu0 %vm302_vm10, %v632_v30  ;;  %967 = vmatprep.subr.mxu0 %v1532_v44 }
 0x3bc   :  { %968 = vmatpush1.msra.mxu0 %v1540_v46  ;;  %1011 = vmatprep.mubr.f32.mxu0 %v1373_v7 }
 0x3bd   :  { %969 = vmatprep.subr.mxu0 %v1549_v48 }
 0x3be   :  { %970 = vmatpush1.msra.mxu0 %v1558_v50 }
 0x3bf   :  { %971 = vmatprep.subr.mxu0 %v1567_v52 }
 0x3c0   :  { %972 = vmatpush1.msra.mxu0 %v1576_v54 }
 0x3c1   :  { %973 = vmatprep.subr.mxu0 %v1585_v56 }
 0x3c2   :  { %974 = vmatpush1.msra.mxu0 %v1594_v58 }
 0x3c3   :  { %975 = vmatprep.subr.mxu0 %v1603_v60 }
 0x3c4   :  { %976 = vmatpush1.msra.mxu0 %v1614_v62 }
 0x3c5   :  { %977 = vmatprep.subr.mxu0 %v1625_v1 }
 0x3c6   :  { %978 = vmatpush1.msra.mxu0 %v1634_v3 }
 0x405   :  { %v405_v38 = vpop.f32.mrf.mxu1 }
 0x406   :  { %v406_v42 = vadd.f32 %v405_v38, %v1708_v20 }
 0x407   :  { %v407_v40 = vpop.f32.mrf.mxu1 }
 0x408   :  { %v408_v35 = vadd.f32 %v407_v40, %v1718_v39 }
 0x409   :  { %v411_v44 = vpop.f32.mrf.mxu1 }
 0x40a   :  { %v412_v52 = vadd.f32 %v411_v44, %v1708_v20 }
 0x40b   :  { %v413_v41 = vpop.f32.mrf.mxu1 }
 0x40c   :  { %v414_v49 = vadd.f32 %v413_v41, %v1718_v39 }
 0x477   :  { %v703_v46 = vpop.f32.mrf.mxu0 }
 0x478   :  { %v714_v48 = vadd.f32 %v703_v46, %v406_v42 }
 0x479   :  { %v705_v50 = vpop.f32.mrf.mxu0 }
 0x47a   :  { %v1219_v54 = vmul.f32 -1.442695, %v714_v48  ;;  %v728_v32 = vadd.f32 %v1716_v37, %v705_v50 }
 0x47b   :  { %v709_v56 = vpop.f32.mrf.mxu0 }
 0x47c   :  { %1321 = vpow2.f32 %v1219_v54  ;;  %v715_v58 = vadd.f32 %v709_v56, %v412_v52 }
 0x47d   :  { %v711_v34 = vpop.f32.mrf.mxu0 }
 0x47e   :  { %v1220_v60 = vmul.f32 -1.442695, %v715_v58  ;;  %v729_v45 = vadd.f32 %v1716_v37, %v711_v34 }
 0x480   :  { %1323 = vpow2.f32 %v1220_v60 }
 0x489   :  { %v1322_v62 = vpop.eup %1321 }
 0x48a   :  { %v722_v1 = vadd.f32 1.0, %v1322_v62 }
 0x48c   :  { %1325 = vrcp.f32 %v722_v1 }
 0x48d   :  { %v1324_v3 = vpop.eup %1323 }
 0x48e   :  { %v723_v31 = vadd.f32 1.0, %v1324_v3 }
 0x490   :  { %1327 = vrcp.f32 %v723_v31 }
 0x499   :  { %v1326_v33 = vpop.eup %1325 }
 0x49a   :  { %v730_v36 = vmul.f32 %v1326_v33, %v728_v32  ;;  %v736_v59 = vsub.f32 1.0, %v1326_v33  ;;  %v748_v0 = vmul.f32 %v1326_v33, %v1730_v19 }
 0x49c   :  { %v732_v43 = vadd.f32 %v730_v36, %v408_v35 }
 0x49d   :  { %v1328_v47 = vpop.eup %1327 }
 0x49e   :  { %1329 = vtanh.f32 %v732_v43  ;;  %v731_v51 = vmul.f32 %v1328_v47, %v729_v45  ;;  %v737_v13 = vsub.f32 1.0, %v1328_v47 }
 0x4a0   :  { %v733_v53 = vadd.f32 %v731_v51, %v414_v49 }
 0x4a2   :  { %1331 = vtanh.f32 %v733_v53 }
 0x4ab   :  { %v1330_v55 = vpop.eup %1329 }
 0x4ac   :  { %740 = vrot.lane.b32.xlu0 %v1330_v55, %s1375_s6 }
 0x4af   :  { %v1332_v57 = vpop.eup %1331 }
 0x4b0   :  { %249 = vrot.lane.b32.xlu0 %v1647_v6, %s1374_s3  ;;  %742 = vrot.lane.b32.xlu1 %v1332_v57, %s1375_s6 }
 0x4b4   :  { %253 = vrot.lane.b32.xlu0 %v1636_v4, %s1374_s3  ;;  %251 = vrot.lane.b32.xlu1 %v1641_v5, %s1374_s3  ;;  %v749_v4 = vmul.f32 %v1328_v47, %v1737_v27 }
 0x4b8   :  { %255 = vrot.lane.b32.xlu1 %v1616_v63, %s1374_s3 }
 0x51e   :  { %v741_v61 = vpop.permute.xlu0 %740 }
 0x51f   :  { %v746_v2 = vmul.f32 %v741_v61, %v736_v59 }
 0x521   :  { %v1782_v12 = vadd.f32 %v748_v0, %v746_v2 }
 0x522   :  { %v250_v6 = vpop.permute.xlu0 %249  ;;  %v743_v14 = vpop.permute.xlu1 %742 }
 0x523   :  { %v270_v15 = vsel %vm265_vm11, %v1657_v9, %v250_v6  ;;  %v747_v18 = vmul.f32 %v743_v14, %v737_v13  ;;  %792 = vrot.lane.b32.xlu0 %v1782_v12, %s1375_s6 }
 0x524   :  { %1209 = vmatmul.mubr.msk.f32.gmra.mxu1 %vm302_vm10, %v270_v15 }
 0x525   :  { %v1790_v63 = vadd.f32 %v749_v4, %v747_v18  ;;  %421 = vmatprep.mubr.f32.mxu1 %v1373_v7 }
 0x526   :  { %v252_v5 = vpop.permute.xlu1 %251  ;;  %v254_v9 = vpop.permute.xlu0 %253 }
 0x527   :  { %v271_v21 = vsel %vm265_vm11, %v1652_v8, %v252_v5  ;;  %794 = vrot.lane.b32.xlu1 %v1790_v63, %s1375_s6  ;;  %v272_v22 = vsel %vm265_vm11, %v1667_v11, %v254_v9 }
 0x528   :  { %1210 = vmatmul.mubr.msk.f32.gmra.mxu1 %vm302_vm10, %v271_v21 }
 0x529   :  { %427 = vmatprep.mubr.f32.mxu1 %v1373_v7 }
 0x52a   :  { %v256_v23 = vpop.permute.xlu1 %255 }
 0x52b   :  { %v273_v24 = vsel %vm265_vm11, %v1661_v10, %v256_v23 }
 0x52c   :  { %1211 = vmatmul.mubr.msk.f32.gmra.mxu1 %vm302_vm10, %v272_v22 }
 0x52d   :  { %433 = vmatprep.mubr.f32.mxu1 %v1373_v7 }
 0x530   :  { %1212 = vmatmul.mubr.msk.f32.gmra.mxu1 %vm302_vm10, %v273_v24 }
 0x531   :  { %864 = vmatprep.mubr.f32.mxu1 %v1373_v7 }
 0x595   :  { %v793_v8 = vpop.permute.xlu0 %792 }
 0x596   :  { %1223 = vmatmul.mubr.msk.f32.vlgmr.msra.gmra.mxu1 %vm302_vm10, %v793_v8 }
 0x597   :  { %870 = vmatprep.mubr.f32.mxu1 %v1373_v7 }
 0x599   :  { %v795_v25 = vpop.permute.xlu1 %794 }
 0x59a   :  { %1224 = vmatmul.mubr.msk.f32.gmra.mxu1 %vm302_vm10, %v795_v25 }
 0x59b   :  { %1298 = vmatprep.mubr.msk.f32.mxu1 %vm1376_vm7, %v1373_v7 }
 0x5e4   :  { %v417_v11 = vpop.f32.mrf.mxu1 }
 0x5e5   :  { %v418_v40 = vadd.f32 %v417_v11, %v1708_v20 }
 0x5e6   :  { %v419_v26 = vpop.f32.mrf.mxu1 }
 0x5e7   :  { %v420_v33 = vadd.f32 %v419_v26, %v1718_v39 }
 0x5e8   :  { %v423_v28 = vpop.f32.mrf.mxu1 }
 0x5e9   :  { %v424_v48 = vadd.f32 %v423_v28, %v1708_v20 }
 0x5ea   :  { %v425_v17 = vpop.f32.mrf.mxu1 }
 0x5eb   :  { %v426_v43 = vadd.f32 %v425_v17, %v1718_v39 }
 0x5ec   :  { %v429_v29 = vpop.f32.mrf.mxu1 }
 0x5ed   :  { %v430_v18 = vadd.f32 %v429_v29, %v1708_v20 }
 0x5ee   :  { %v1810_v30 = vpop.f32.mrf.mxu1 }
 0x5f0   :  { %v435_v10 = vpop.f32.mrf.mxu1 }
 0x5f1   :  { %v436_v22 = vadd.f32 %v435_v10, %v1708_v20  ;;  %v432_v20 = vadd.f32 %v1810_v30, %v1718_v39  ;;  %v1107_v30 = vld [vmem:[%s2002_s7 + $0x30] sm:$0xff] }
 0x5f2   :  { %v1812_v38 = vpop.f32.mrf.mxu1 }
 0x656   :  { %v866_v42 = vpop.f32.mrf.mxu1 }
 0x657   :  { %v877_v44 = vadd.f32 %v866_v42, %v418_v40 }
 0x658   :  { %v868_v46 = vpop.f32.mrf.mxu1 }
 0x659   :  { %v1225_v50 = vmul.f32 -1.442695, %v877_v44  ;;  %v891_v3 = vadd.f32 %v1716_v37, %v868_v46 }
 0x65a   :  { %v872_v52 = vpop.f32.mrf.mxu1 }
 0x65b   :  { %1333 = vpow2.f32 %v1225_v50  ;;  %v878_v54 = vadd.f32 %v872_v52, %v424_v48  ;;  %v438_v50 = vadd.f32 %v1812_v38, %v1718_v39  ;;  %v1106_v39 = vld [vmem:[%s2002_s7 + $0x28] sm:$0xff]  ;;  %v1105_v38 = vld [vmem:[%s2002_s7 + $0x20] sm:$0xff] }
 0x65c   :  { %v874_v32 = vpop.f32.mrf.mxu1 }
 0x65d   :  { %v1226_v56 = vmul.f32 -1.442695, %v878_v54  ;;  %v892_v36 = vadd.f32 %v1716_v37, %v874_v32 }
 0x65f   :  { %1335 = vpow2.f32 %v1226_v56 }
 0x668   :  { %v1334_v58 = vpop.eup %1333 }
 0x669   :  { %v885_v60 = vadd.f32 1.0, %v1334_v58 }
 0x66b   :  { %1337 = vrcp.f32 %v885_v60  ;;  %v1104_v60 = vld [vmem:[%s2002_s7 + $0x18] sm:$0xff] }
 0x66c   :  { %v1336_v62 = vpop.eup %1335 }
 0x66d   :  { %v886_v1 = vadd.f32 1.0, %v1336_v62  ;;  %v1103_v62 = vld [vmem:[%s2002_s7 + $0x10] sm:$0xff] }
 0x66f   :  { %1339 = vrcp.f32 %v886_v1  ;;  %v465_v1 = vadd.s32 8, %v1702_v16 }
 0x678   :  { %v1338_v31 = vpop.eup %1337 }
 0x679   :  { %v893_v34 = vmul.f32 %v1338_v31, %v891_v3  ;;  %v899_v53 = vsub.f32 1.0, %v1338_v31  ;;  %v911_v57 = vmul.f32 %v1338_v31, %v1782_v12  ;;  %v753_v3 = vstv %s1221_s17 }
 0x67a   :  { %vm1876_vm12 = vcmp.eq.s32.totalorder %v465_v1, %v753_v3  ;;  %vm1881_vm13 = vcmp.eq.s32.totalorder %v1702_v16, %v753_v3 }
 0x67b   :  { %v895_v35 = vadd.f32 %v893_v34, %v420_v33  ;;  %v588_v33 = vstv %s587_s18  ;;  %v757_v34 = vstv %s1222_s19 }
 0x67c   :  { %v1340_v41 = vpop.eup %1339  ;;  %vm1888_vm14 = vcmp.eq.s32.totalorder %v465_v1, %v588_v33  ;;  %vm1892_vm15 = vcmp.eq.s32.totalorder %v465_v1, %v757_v34  ;;  %vm1903_vm2 = vcmp.eq.s32.totalorder %v1702_v16, %v588_v33  ;;  %vm1908_vm3 = vcmp.eq.s32.totalorder %v1702_v16, %v757_v34 }
 0x67d   :  { %1341 = vtanh.f32 %v895_v35  ;;  %v894_v45 = vmul.f32 %v1340_v41, %v892_v36  ;;  %v900_v0 = vsub.f32 1.0, %v1340_v41  ;;  %v912_v13 = vmul.f32 %v1340_v41, %v1790_v63  ;;  %v1102_v36 = vld [vmem:[%s2002_s7 + $0x8] sm:$0xff] }
 0x67e   :  { %v765_v35 = vsel %vm1876_vm12, %v1790_v63, 0.0 }
 0x67f   :  { %v896_v47 = vadd.f32 %v894_v45, %v426_v43  ;;  %v764_v43 = vsel %vm1881_vm13, %v1782_v12, 0.0 }
 0x681   :  { %1343 = vtanh.f32 %v896_v47 }
 0x68a   :  { %v1342_v49 = vpop.eup %1341 }
 0x68b   :  { %903 = vrot.lane.b32.xlu0 %v1342_v49, %s1375_s6 }
 0x68e   :  { %v1344_v51 = vpop.eup %1343 }
 0x68f   :  { %905 = vrot.lane.b32.xlu1 %v1344_v51, %s1375_s6  ;;  %v767_v51 = vsel %vm601_vm1, %v765_v35, 0.0 }
 0x6fd   :  { %v904_v55 = vpop.permute.xlu0 %903 }
 0x6fe   :  { %v909_v59 = vmul.f32 %v904_v55, %v899_v53  ;;  %v592_v53 = vstv %s1216_s20  ;;  %v600_v55 = vsel %vm1888_vm14, %v1737_v27, 0.0 }
 0x6ff   :  { %vm1919_vm4 = vcmp.eq.s32.totalorder %v465_v1, %v592_v53  ;;  %vm1935_vm5 = vcmp.eq.s32.totalorder %v1702_v16, %v592_v53  ;;  %v779_v16 = vsel %vm1908_vm3, %v1782_v12, 0.0 }
 0x700   :  { %v1823_v61 = vadd.f32 %v911_v57, %v909_v59 }
 0x701   :  { %v906_v2 = vpop.permute.xlu1 %905 }
 0x702   :  { %v910_v6 = vmul.f32 %v906_v2, %v900_v0  ;;  %939 = vrot.lane.b32.xlu0 %v1823_v61, %s1375_s6  ;;  %v915_v57 = vsel %vm1908_vm3, %v1823_v61, 0.0  ;;  %v766_v0 = vsel %vm601_vm1, %v764_v43, 0.0 }
 0x704   :  { %v1828_v14 = vadd.f32 %v912_v13, %v910_v6  ;;  %v599_v6 = vsel %vm1903_vm2, %v1730_v19, 0.0 }
 0x706   :  { %941 = vrot.lane.b32.xlu1 %v1828_v14, %s1375_s6  ;;  %v916_v45 = vsel %vm1892_vm15, %v1828_v14, 0.0  ;;  %v927_v13 = vsel %vm1876_vm12, %v1828_v14, 0.0  ;;  %vm1182_vm12 = vcmask 125952  }
 0x707   :  { %v918_v2 = vsel %vm601_vm1, %v916_v45, 0.0 }
 0x774   :  { %v940_v15 = vpop.permute.xlu0 %939 }
 0x775   :  { %1227 = vmatmul.mubr.msk.f32.vlgmr.msra.gmra.mxu0 %vm302_vm10, %v940_v15  ;;  %v768_v15 = vadd.f32 %v767_v51, %v766_v0 }
 0x776   :  { %1017 = vmatprep.mubr.f32.mxu0 %v1373_v7 }
 0x778   :  { %v942_v4 = vpop.permute.xlu1 %941 }
 0x779   :  { %1228 = vmatmul.mubr.msk.f32.gmra.mxu0 %vm302_vm10, %v942_v4  ;;  %v780_v4 = vsel %vm1892_vm15, %v1790_v63, 0.0 }
 0x835   :  { %v1013_v5 = vpop.f32.mrf.mxu0 }
 0x836   :  { %v1024_v21 = vadd.f32 %v1013_v5, %v430_v18  ;;  %v603_v5 = vsel %vm601_vm1, %v600_v55, 0.0  ;;  %v1101_v18 = vld [vmem:[%s2002_s7] sm:$0xff] }
 0x837   :  { %v1015_v9 = vpop.f32.mrf.mxu0 }
 0x838   :  { %v1229_v23 = vmul.f32 -1.442695, %v1024_v21  ;;  %v1038_v40 = vadd.f32 %v1716_v37, %v1015_v9  ;;  %v917_v21 = vsel %vm601_vm1, %v915_v57, 0.0  ;;  %v926_v9 = vsel %vm1881_vm13, %v1823_v61, 0.0 }
 0x839   :  { %v1019_v24 = vpop.f32.mrf.mxu0  ;;  %v919_v63 = vadd.f32 %v918_v2, %v917_v21 }
 0x83a   :  { %1345 = vpow2.f32 %v1229_v23  ;;  %v1025_v8 = vadd.f32 %v1019_v24, %v436_v22  ;;  %v616_v22 = vsel %vm1919_vm4, %v1737_v27, 0.0  ;;  %v929_v23 = vsel %vm617_vm6, %v927_v13, 0.0 }
 0x83b   :  { %v1021_v42 = vpop.f32.mrf.mxu0  ;;  %v602_v24 = vsel %vm601_vm1, %v599_v6, 0.0  ;;  %v619_v27 = vsel %vm617_vm6, %v616_v22, 0.0 }
 0x83c   :  { %v1230_v25 = vmul.f32 -1.442695, %v1025_v8  ;;  %v1039_v46 = vadd.f32 %v1716_v37, %v1021_v42  ;;  %v1108_v37 = vld [vmem:[%s2002_s7 + $0x38] sm:$0xff]  ;;  %v782_v8 = vsel %vm617_vm6, %v780_v4, 0.0 }
 0x83d   :  { %1283 = vmatpush3.msra.mxu1 %v1108_v37 }
 0x83e   :  { %1347 = vpow2.f32 %v1230_v25  ;;  %1284 = vmatprep.subr.mxu1 %v1373_v7  ;;  %v615_v25 = vsel %vm1935_vm5, %v1730_v19, 0.0 }
 0x83f   :  { %1285 = vmatpush3.msra.mxu1 %v1107_v30 }
 0x840   :  { %1286 = vmatprep.subr.mxu1 %v1373_v7 }
 0x841   :  { %1287 = vmatpush3.msra.mxu1 %v1106_v39 }
 0x842   :  { %1288 = vmatprep.subr.mxu1 %v1373_v7 }
 0x843   :  { %1289 = vmatpush3.msra.mxu1 %v1105_v38 }
 0x844   :  { %1290 = vmatprep.subr.mxu1 %v1373_v7 }
 0x845   :  { %1291 = vmatpush3.msra.mxu1 %v1104_v60 }
 0x846   :  { %1292 = vmatprep.subr.mxu1 %v1373_v7 }
 0x847   :  { %v1346_v11 = vpop.eup %1345  ;;  %1293 = vmatpush3.msra.mxu1 %v1103_v62 }
 0x848   :  { %v1032_v26 = vadd.f32 1.0, %v1346_v11  ;;  %1294 = vmatprep.subr.mxu1 %v1373_v7  ;;  %v604_v11 = vadd.f32 %v603_v5, %v602_v24 }
 0x849   :  { %1295 = vmatpush3.msra.mxu1 %v1102_v36 }
 0x84a   :  { %1349 = vrcp.f32 %v1032_v26  ;;  %v769_v26 = vrot.slane %v768_v15, 4  ;;  %1296 = vmatprep.subr.mxu1 %v1373_v7 }
 0x84b   :  { %v1348_v28 = vpop.eup %1347  ;;  %1297 = vmatpush3.msra.mxu1 %v1101_v18 }
 0x84c   :  { %v1033_v17 = vadd.f32 1.0, %v1348_v28  ;;  %v928_v28 = vsel %vm617_vm6, %v926_v9, 0.0 }
 0x84d   :  { %v930_v12 = vadd.f32 %v929_v23, %v928_v28 }
 0x84e   :  { %1351 = vrcp.f32 %v1033_v17  ;;  %v781_v17 = vsel %vm617_vm6, %v779_v16, 0.0 }
 0x84f   :  { %v783_v42 = vadd.f32 %v782_v8, %v781_v17 }
 0x851   :  { %v784_v38 = vrot.slane %v783_v42, 4 }
 0x853   :  { %v785_v35 = vadd.f32 %v784_v38, %v783_v42 }
 0x855   :  { %v786_v13 = vrot.slane %v785_v35, 2 }
 0x857   :  { %v1838_v29 = vpop.eup %1349 }
 0x858   :  { %v1040_v10 = vmul.f32 %v1838_v29, %v1038_v40  ;;  %v1046_v40 = vsub.f32 1.0, %v1838_v29 }
 0x85a   :  { %v1042_v44 = vadd.f32 %v1040_v10, %v432_v20  ;;  %v618_v20 = vsel %vm617_vm6, %v615_v25, 0.0 }
 0x85b   :  { %v1844_v48 = vpop.eup %1351 }
 0x85c   :  { %1353 = vtanh.f32 %v1042_v44  ;;  %v1041_v52 = vmul.f32 %v1844_v48, %v1039_v46  ;;  %v920_v44 = vrot.slane %v919_v63, 4  ;;  %v1058_v46 = vmul.f32 %v1838_v29, %v1823_v61 }
 0x85d   :  { %v1047_v37 = vsub.f32 1.0, %v1844_v48  ;;  %v1059_v1 = vmul.f32 %v1844_v48, %v1828_v14 }
 0x85e   :  { %v1043_v54 = vadd.f32 %v1041_v52, %v438_v50  ;;  %v605_v50 = vrot.slane %v604_v11, 4  ;;  %v620_v52 = vadd.f32 %v619_v27, %v618_v20  ;;  %v921_v39 = vadd.f32 %v920_v44, %v919_v63 }
 0x85f   :  { %v787_v63 = vadd.f32 %v786_v13, %v785_v35 }
 0x860   :  { %1355 = vtanh.f32 %v1043_v54  ;;  %v770_v54 = vadd.f32 %v769_v26, %v768_v15  ;;  %v606_v60 = vadd.f32 %v605_v50, %v604_v11  ;;  %v621_v62 = vrot.slane %v620_v52, 4 }
 0x861   :  { %v922_v34 = vrot.slane %v921_v39, 2 }
 0x862   :  { %v771_v31 = vrot.slane %v770_v54, 2  ;;  %v607_v41 = vrot.slane %v606_v60, 2  ;;  %v622_v14 = vadd.f32 %v621_v62, %v620_v52 }
 0x863   :  { %v923_v2 = vadd.f32 %v922_v34, %v921_v39 }
 0x864   :  { %v772_v57 = vadd.f32 %v771_v31, %v770_v54  ;;  %v608_v59 = vadd.f32 %v607_v41, %v606_v60  ;;  %v623_v4 = vrot.slane %v622_v14, 2 }
 0x865   :  { %v924_v16 = vrot.slane %v923_v2, 1 }
 0x866   :  { %v773_v9 = vrot.slane %v772_v57, 1  ;;  %v609_v24 = vrot.slane %v608_v59, 1  ;;  %v624_v25 = vadd.f32 %v623_v4, %v622_v14 }
 0x867   :  { %v925_v17 = vadd.f32 %v924_v16, %v923_v2 }
 0x868   :  { %v774_v26 = vadd.f32 %v773_v9, %v772_v57  ;;  %v610_v42 = vadd.f32 %v609_v24, %v608_v59 }
 0x869   :  { %v1354_v56 = vpop.eup %1353 }
 0x86a   :  { %1050 = vrot.lane.b32.xlu0 %v1354_v56, %s1375_s6  ;;  %v931_v56 = vrot.slane %v930_v12, 4  ;;  %v1085_v7 = vsel %vm1084_vm8, %v610_v42, %v774_v26 }
 0x86b   :  { %v1086_v50 = vsel %vm124_vm0, %v1085_v7, %v925_v17 }
 0x86c   :  { %v932_v32 = vadd.f32 %v931_v56, %v930_v12  ;;  %v788_v12 = vrot.slane %v787_v63, 1 }
 0x86d   :  { %v1356_v58 = vpop.eup %1355 }
 0x86e   :  { %1052 = vrot.lane.b32.xlu1 %v1356_v58, %s1375_s6  ;;  %v933_v0 = vrot.slane %v932_v32, 2  ;;  %v789_v52 = vadd.f32 %v788_v12, %v787_v63 }
 0x870   :  { %v934_v22 = vadd.f32 %v933_v0, %v932_v32 }
 0x872   :  { %v935_v27 = vrot.slane %v934_v22, 1 }
 0x8dc   :  { %v1051_v10 = vpop.permute.xlu0 %1050 }
 0x8dd   :  { %v1056_v19 = vmul.f32 %v1051_v10, %v1046_v40  ;;  %v625_v10 = vrot.slane %v624_v25, 1 }
 0x8df   :  { %v1060_v58 = vadd.f32 %v1058_v46, %v1056_v19  ;;  %v936_v46 = vadd.f32 %v935_v27, %v934_v22  ;;  %v626_v56 = vadd.f32 %v625_v10, %v624_v25 }
 0x8e0   :  { %v1053_v30 = vpop.permute.xlu1 %1052 }
 0x8e1   :  { %v1057_v3 = vmul.f32 %v1053_v30, %v1047_v37  ;;  %v1062_v61 = vsel %vm1935_vm5, %v1060_v58, 0.0  ;;  %v1073_v29 = vsel %vm1903_vm2, %v1060_v58, 0.0 }
 0x8e2   :  { %v1064_v48 = vsel %vm601_vm1, %v1062_v61, 0.0  ;;  %v1075_v49 = vsel %vm617_vm6, %v1073_v29, 0.0 }
 0x8e3   :  { %v1061_v33 = vadd.f32 %v1059_v1, %v1057_v3 }
 0x8e5   :  { %v1063_v43 = vsel %vm1919_vm4, %v1061_v33, 0.0  ;;  %v1074_v45 = vsel %vm1888_vm14, %v1061_v33, 0.0 }
 0x8e6   :  { %v1065_v51 = vsel %vm601_vm1, %v1063_v43, 0.0  ;;  %v1076_v47 = vsel %vm617_vm6, %v1074_v45, 0.0 }
 0x8e7   :  { %v1066_v53 = vadd.f32 %v1065_v51, %v1064_v48  ;;  %v1077_v55 = vadd.f32 %v1076_v47, %v1075_v49 }
 0x8e9   :  { %v1067_v6 = vrot.slane %v1066_v53, 4  ;;  %v1078_v15 = vrot.slane %v1077_v55, 4 }
 0x8eb   :  { %v1068_v5 = vadd.f32 %v1067_v6, %v1066_v53  ;;  %v1079_v21 = vadd.f32 %v1078_v15, %v1077_v55 }
 0x8ed   :  { %v1080_v23 = vrot.slane %v1079_v21, 2  ;;  %v1069_v8 = vrot.slane %v1068_v5, 2 }
 0x8ef   :  { %v1081_v11 = vadd.f32 %v1080_v23, %v1079_v21  ;;  %v1070_v28 = vadd.f32 %v1069_v8, %v1068_v5 }
 0x8f1   :  { %v1082_v40 = vrot.slane %v1081_v11, 1  ;;  %v1071_v20 = vrot.slane %v1070_v28, 1 }
 0x8f3   :  { %v1072_v44 = vadd.f32 %v1071_v20, %v1070_v28  ;;  %v1083_v19 = vadd.f32 %v1082_v40, %v1081_v11 }
 0x8f5   :  { %v1088_v54 = vsel %vm1087_vm9, %v1086_v50, %v1072_v44  ;;  %v1089_v58 = vsel %vm1084_vm8, %v1083_v19, %v936_v46 }
 0x8f6   :  { %1093 = vrot.lane.b32.xlu0 %v1088_v54, %s1375_s6  ;;  %v1090_v37 = vsel %vm124_vm0, %v1089_v58, %v789_v52 }
 0x8f7   :  { %v1091_v30 = vsel %vm1087_vm9, %v1090_v37, %v626_v56 }
 0x8f8   :  { %1097 = vrot.lane.b32.xlu1 %v1091_v30, %s1375_s6 }
 0x968   :  { %v1094_v39 = vpop.permute.xlu0 %1093 }
 0x96a   :  { %v1098_v38 = vpop.permute.xlu1 %1097 }
 0x96b   :  { %v1100_v60 = vsel %vm265_vm11, %v1094_v39, %v1098_v38 }
 0x96c   :  { %1299 = vmatmul.mubr.msk.f32.vlgmr.msra.gmra.mxu1 %vm302_vm10, %v1100_v60 }
 0xa2c   :  { %v1178_v62 = vpop.f32.mrf.mxu1 }
 0xa2d   :  { %1183 = vst.msk [vmem:[%s2003_s8] sm:$0xf] %vm1182_vm12, %v1178_v62 }
 0xa2e   :  { %v1300_v1 = vpop.f32.mrf.mxu1 }

</bundles_post_ra>
